<compile_context>
chip_gen: v6e
topology: v6e:2x2x1
jax: 0.10.0
libtpu: 0.0.40
codegen_flags: <defaults>
</compile_context>

<pallas_src>
import functools

import jax
import jax.numpy as jnp
from jax.experimental import pallas as pl
from jax.experimental.pallas import tpu as pltpu

EPS = 1e-5  # nn.InstanceNorm2d default eps

# Tap order matches the (ky*3+kx) flattening of the conv weights below.
_TAP_OFFSETS = tuple((dy, dx) for dy in (-1, 0, 1) for dx in (-1, 0, 1))


# --------------------------- kernel helpers -----------------------------------

def _adain_relu(x, gamma, beta):
    """InstanceNorm -> (1+gamma)*xhat + beta -> ReLU.

    x: (C, HW) f32; gamma/beta: (C, 1) f32; returns (C, HW) f32.
    Single-pass stats in f32 (biased variance, eps=1e-5, like InstanceNorm2d).
    """
    hw = x.shape[1]
    inv_hw = 1.0 / float(hw)
    s1 = jnp.sum(x, axis=1, keepdims=True)            # (C, 1)
    s2 = jnp.sum(x * x, axis=1, keepdims=True)        # (C, 1)
    mean = s1 * inv_hw
    var = jnp.maximum(s2 * inv_hw - mean * mean, 0.0)
    scale = (1.0 + gamma) * jax.lax.rsqrt(var + EPS)
    shift = beta - mean * scale
    return jnp.maximum(x * scale + shift, 0.0)


def _im2col_into_slab(y, slab_ref, col0, H, W, row_ge1, row_lastm1, w_idx):
    """Write the 9 conv taps of y (C, HW) into slab rows [t*C:(t+1)*C],
    columns [col0:col0+HW].  Each tap = lane roll + static boundary mask
    (replaces the old padded-halo buffer + per-tap relayouting reshape)."""
    C, HW = y.shape
    for t, (dy, dx) in enumerate(_TAP_OFFSETS):
        d = dy * W + dx
        shift = (-d) % HW
        tap = pltpu.roll(y, shift=shift, axis=1) if shift else y
        conds = []
        if dy < 0:
            conds.append(row_ge1)                      # need h >= 1
        elif dy > 0:
            conds.append(row_lastm1)                   # need h <= H-2
        if dx < 0:
            conds.append(w_idx >= 1)                   # need w >= 1
        elif dx > 0:
            conds.append(w_idx < W - 1)                # need w <= W-2
        if conds:
            m = conds[0]
            for c in conds[1:]:
                m = jnp.logical_and(m, c)
            tap = jnp.where(m, tap, jnp.zeros_like(tap))
        # f32 slab: 8-row offsets are sublane-tile aligned; full-lane stores.
        slab_ref[t * C:(t + 1) * C, col0:col0 + HW] = tap


# --------------------------- fused kernel -------------------------------------

def _residual_block_kernel(x_ref, g1_ref, b1_ref, g2_ref, b2_ref,
                           w1_ref, cb1_ref, w2_ref, cb2_ref,
                           o_ref, slab_ref, *, H, W):
    BT, C, HW = x_ref.shape
    Cout = o_ref.shape[1]

    # Boundary predicates from a lane iota (no padded buffer, no zeroing).
    pcol = jax.lax.broadcasted_iota(jnp.int32, (1, HW), 1)
    row_ge1 = pcol >= W                 # h >= 1
    row_lastm1 = pcol < (HW - W)        # h <= H-2
    if (W & (W - 1)) == 0:              # power-of-two fast path (no integer div)
        w_idx = jnp.bitwise_and(pcol, W - 1)
    else:
        w_idx = jnp.remainder(pcol, W)

    # ---- stage 1: AdaIN -> ReLU -> im2col per image, one big-K MXU matmul ----
    for b in range(BT):
        y = _adain_relu(x_ref[b], g1_ref[b], b1_ref[b])
        _im2col_into_slab(y, slab_ref, b * HW, H, W, row_ge1, row_lastm1, w_idx)
    t1 = jnp.dot(w1_ref[...], slab_ref[...].astype(jnp.bfloat16),
                 preferred_element_type=jnp.float32) + cb1_ref[...]   # (Cout, BT*HW)

    # ---- stage 2 (slab scratch reused; stage-1 contents are dead here) -------
    for b in range(BT):
        y = _adain_relu(t1[:, b * HW:(b + 1) * HW], g2_ref[b], b2_ref[b])
        _im2col_into_slab(y, slab_ref, b * HW, H, W, row_ge1, row_lastm1, w_idx)
    t2 = jnp.dot(w2_ref[...], slab_ref[...].astype(jnp.bfloat16),
                 preferred_element_type=jnp.float32) + cb2_ref[...]   # (Cout, BT*HW)

    # ---- fused residual add; (C, HW) stores are lane-dense (HW >= 128) -------
    for b in range(BT):
        o_ref[b] = x_ref[b] + t2[:, b * HW:(b + 1) * HW]


# --------------------------- wrapper -------------------------------------------

def residual_block_forward(params, x_nchw, s):
    """x_nchw: (N, C_in, H, W), s: (N, 1, style_dim) -> (N, C_out, H, W)."""
    N, C_in, H, W = x_nchw.shape
    C_out = params["conv1_w"].shape[0]
    assert C_in == C_out, "x + residual skip requires dim_in == dim_out"
    HW = H * W

    # Batch tile: fold a few images per grid step (amortize per-step overhead,
    # widen the MXU N dim to BT*HW).
    BT = next(bt for bt in (8, 4, 2, 1) if N % bt == 0)

    # Trivial collapse of NCHW — no transpose, no extra HBM traffic.
    x = x_nchw.reshape(N, C_in, HW)
    style = s.reshape(-1, s.shape[2])                      # (N, style_dim)

    # Tiny style FCs stay in XLA (far below pallas_call overhead).
    h1 = style @ params["fc1_w"].T + params["fc1_b"]       # (N, 2*C_in)
    h2 = style @ params["fc2_w"].T + params["fc2_b"]       # (N, 2*C_out)
    g1 = h1[:, :C_in].reshape(N, C_in, 1)
    b1 = h1[:, C_in:].reshape(N, C_in, 1)
    g2 = h2[:, :C_out].reshape(N, C_out, 1)
    b2 = h2[:, C_out:].reshape(N, C_out, 1)

    # Conv weights: OIHW -> (Cout, ky, kx, Cin) -> (Cout, 9*Cin), bf16 for MXU.
    w1 = jnp.transpose(params["conv1_w"], (0, 2, 3, 1)).reshape(
        C_out, 9 * C_in).astype(jnp.bfloat16)
    w2 = jnp.transpose(params["conv2_w"], (0, 2, 3, 1)).reshape(
        C_out, 9 * C_out).astype(jnp.bfloat16)
    cb1 = params["conv1_b"].reshape(C_out, 1)
    cb2 = params["conv2_b"].reshape(C_out, 1)

    kernel = functools.partial(_residual_block_kernel, H=H, W=W)

    out = pl.pallas_call(
        kernel,
        out_shape=jax.ShapeDtypeStruct((N, C_out, HW), jnp.float32),
        grid=(N // BT,),
        in_specs=[
            pl.BlockSpec((BT, C_in, HW), lambda n: (n, 0, 0)),    # x
            pl.BlockSpec((BT, C_in, 1), lambda n: (n, 0, 0)),     # gamma1
            pl.BlockSpec((BT, C_in, 1), lambda n: (n, 0, 0)),     # beta1
            pl.BlockSpec((BT, C_out, 1), lambda n: (n, 0, 0)),    # gamma2
            pl.BlockSpec((BT, C_out, 1), lambda n: (n, 0, 0)),    # beta2
            pl.BlockSpec((C_out, 9 * C_in), lambda n: (0, 0)),    # w1 (bf16)
            pl.BlockSpec((C_out, 1), lambda n: (0, 0)),           # conv1 bias
            pl.BlockSpec((C_out, 9 * C_out), lambda n: (0, 0)),   # w2 (bf16)
            pl.BlockSpec((C_out, 1), lambda n: (0, 0)),           # conv2 bias
        ],
        out_specs=pl.BlockSpec((BT, C_out, HW), lambda n: (n, 0, 0)),
        scratch_shapes=[
            # One shared im2col slab for both conv stages.
            # TODO(synk): switch to bf16 (and row-tile the spatial axis) at
            # production C >= 16 / large H*W for v7x's 64 MiB VMEM.
            pltpu.VMEM((9 * C_in, BT * HW), jnp.float32),
        ],
        compiler_params=pltpu.CompilerParams(
            dimension_semantics=("parallel",),
        ),
    )(x, g1, b1, g2, b2, w1, cb1, w2, cb2)

    return out.reshape(N, C_out, H, W)


# --------------------------- parameters ----------------------------------------

def init_params(key, dim_in, dim_out, style_dim=64):
    ks = jax.random.split(key, 8)
    sc = 0.1
    return {
        "fc1_w": jax.random.normal(ks[0], (2 * dim_in, style_dim), jnp.float32) * sc,
        "fc1_b": jax.random.normal(ks[1], (2 * dim_in,), jnp.float32) * sc,
        "fc2_w": jax.random.normal(ks[2], (2 * dim_out, style_dim), jnp.float32) * sc,
        "fc2_b": jax.random.normal(ks[3], (2 * dim_out,), jnp.float32) * sc,
        "conv1_w": jax.random.normal(ks[4], (dim_out, dim_in, 3, 3), jnp.float32) * sc,  # OIHW
        "conv1_b": jax.random.normal(ks[5], (dim_out,), jnp.float32) * sc,
        "conv2_w": jax.random.normal(ks[6], (dim_out, dim_out, 3, 3), jnp.float32) * sc,
        "conv2_b": jax.random.normal(ks[7], (dim_out,), jnp.float32) * sc,
    }


# --------------------------- pure-JAX reference --------------------------------

def reference_forward(params, x, s):
    def adain(x, style, w, b):
        h = style @ w.T + b
        C = x.shape[1]
        gamma = h[:, :C].reshape(-1, C, 1, 1)
        beta = h[:, C:].reshape(-1, C, 1, 1)
        mean = jnp.mean(x, axis=(2, 3), keepdims=True)
        var = jnp.mean((x - mean) ** 2, axis=(2, 3), keepdims=True)
        xhat = (x - mean) / jnp.sqrt(var + EPS)
        return (1 + gamma) * xhat + beta

    def conv(x, w, b):
        y = jax.lax.conv_general_dilated(
            x, w, (1, 1), ((1, 1), (1, 1)),
            dimension_numbers=("NCHW", "OIHW", "NCHW"))
        return y + b.reshape(1, -1, 1, 1)

    style = s.reshape(-1, s.shape[2])
    t = adain(x, style, params["fc1_w"], params["fc1_b"])
    t = jnp.maximum(t, 0.0)
    t = conv(t, params["conv1_w"], params["conv1_b"])
    t = adain(t, style, params["fc2_w"], params["fc2_b"])
    t = jnp.maximum(t, 0.0)
    t = conv(t, params["conv2_w"], params["conv2_b"])
    return x + t


# --------------------------- main -----------------------------------------------

if __name__ == "__main__":
    key = jax.random.PRNGKey(0)
    kp, kx, ks = jax.random.split(key, 3)

    N, C, H, W, STYLE_DIM = 2, 8, 16, 16, 64   # dim_in == dim_out (skip connection)
    params = init_params(kp, C, C, STYLE_DIM)
    x = jax.random.normal(kx, (N, C, H, W), jnp.float32)
    s = jax.random.normal(ks, (N, 1, STYLE_DIM), jnp.float32)

    fwd = jax.jit(residual_block_forward)
    out = jax.block_until_ready(fwd(params, x, s))

    ref = reference_forward(params, x, s)
    assert out.shape == ref.shape == (N, C, H, W)
    max_err = float(jnp.max(jnp.abs(out - ref)))
    # bf16 MXU operands (f32 accumulation) vs. a pure-f32 reference -> loosened tol.
    if max_err < 5e-2:
        print("KERNEL_OK")
    else:
        print(f"MISMATCH max_err={max_err}")
</pallas_src>

<mosaic_0001>
module attributes {stable_mosaic.version = 11 : i64} {
  func.func @_residual_block_kernel(%arg0: i32, %arg1: memref<2x8x256xf32, #tpu.memory_space<vmem>>, %arg2: memref<2x8x1xf32, #tpu.memory_space<vmem>>, %arg3: memref<2x8x1xf32, #tpu.memory_space<vmem>>, %arg4: memref<2x8x1xf32, #tpu.memory_space<vmem>>, %arg5: memref<2x8x1xf32, #tpu.memory_space<vmem>>, %arg6: memref<8x72xbf16, #tpu.memory_space<vmem>>, %arg7: memref<8x1xf32, #tpu.memory_space<vmem>>, %arg8: memref<8x72xbf16, #tpu.memory_space<vmem>>, %arg9: memref<8x1xf32, #tpu.memory_space<vmem>>, %arg10: memref<2x8x256xf32, #tpu.memory_space<vmem>>, %arg11: memref<72x512xf32, #tpu.memory_space<vmem>>) attributes {dimension_semantics = [#tpu.dimension_semantics<parallel>], iteration_bounds = array<i64: 1>, scalar_prefetch = 0 : i64, scratch_operands = 1 : i64, tpu.core_type = #tpu.core_type<tc>, window_params = [{transform_indices = @transform_0, window_bounds = array<i64: 2, 8, 256>}, {transform_indices = @transform_1, window_bounds = array<i64: 2, 8, 1>}, {transform_indices = @transform_2, window_bounds = array<i64: 2, 8, 1>}, {transform_indices = @transform_3, window_bounds = array<i64: 2, 8, 1>}, {transform_indices = @transform_4, window_bounds = array<i64: 2, 8, 1>}, {pipeline_mode = #tpu.pipeline_mode<synchronous>, transform_indices = @transform_5, window_bounds = array<i64: 8, 72>}, {pipeline_mode = #tpu.pipeline_mode<synchronous>, transform_indices = @transform_6, window_bounds = array<i64: 8, 1>}, {pipeline_mode = #tpu.pipeline_mode<synchronous>, transform_indices = @transform_7, window_bounds = array<i64: 8, 72>}, {pipeline_mode = #tpu.pipeline_mode<synchronous>, transform_indices = @transform_8, window_bounds = array<i64: 8, 1>}, {transform_indices = @transform_9, window_bounds = array<i64: 2, 8, 256>}]} {
    %0 = tpu.iota {dimensions = array<i32: 1>} : vector<1x256xi32>
    %c16_i32 = arith.constant 16 : i32
    %1 = vector.broadcast %c16_i32 : i32 to vector<1x256xi32>
    %2 = arith.cmpi sge, %0, %1 : vector<1x256xi32>
    %c240_i32 = arith.constant 240 : i32
    %3 = vector.broadcast %c240_i32 : i32 to vector<1x256xi32>
    %4 = arith.cmpi slt, %0, %3 : vector<1x256xi32>
    %c15_i32 = arith.constant 15 : i32
    %5 = vector.broadcast %c15_i32 : i32 to vector<1x256xi32>
    %6 = arith.andi %0, %5 : vector<1x256xi32>
    %c0 = arith.constant 0 : index
    %c0_0 = arith.constant 0 : index
    %c0_1 = arith.constant 0 : index
    %7 = vector.load %arg1[%c0, %c0_0, %c0_1] : memref<2x8x256xf32, #tpu.memory_space<vmem>>, vector<1x8x256xf32>
    %8 = vector.shape_cast %7 : vector<1x8x256xf32> to vector<8x256xf32>
    %c0_2 = arith.constant 0 : index
    %c0_3 = arith.constant 0 : index
    %c0_4 = arith.constant 0 : index
    %9 = vector.load %arg2[%c0_2, %c0_3, %c0_4] : memref<2x8x1xf32, #tpu.memory_space<vmem>>, vector<1x8x1xf32>
    %10 = vector.shape_cast %9 : vector<1x8x1xf32> to vector<8x1xf32>
    %c0_5 = arith.constant 0 : index
    %c0_6 = arith.constant 0 : index
    %c0_7 = arith.constant 0 : index
    %11 = vector.load %arg3[%c0_5, %c0_6, %c0_7] : memref<2x8x1xf32, #tpu.memory_space<vmem>>, vector<1x8x1xf32>
    %12 = vector.shape_cast %11 : vector<1x8x1xf32> to vector<8x1xf32>
    %cst = arith.constant dense<0.000000e+00> : vector<8xf32>
    %13 = vector.multi_reduction <add>, %8, %cst [1] : vector<8x256xf32> to vector<8xf32>
    %14 = vector.shape_cast %13 : vector<8xf32> to vector<8x1xf32>
    %15 = arith.mulf %8, %8 : vector<8x256xf32>
    %cst_8 = arith.constant dense<0.000000e+00> : vector<8xf32>
    %16 = vector.multi_reduction <add>, %15, %cst_8 [1] : vector<8x256xf32> to vector<8xf32>
    %17 = vector.shape_cast %16 : vector<8xf32> to vector<8x1xf32>
    %cst_9 = arith.constant 3.906250e-03 : f32
    %18 = vector.broadcast %cst_9 : f32 to vector<8x1xf32>
    %19 = arith.mulf %14, %18 : vector<8x1xf32>
    %cst_10 = arith.constant 3.906250e-03 : f32
    %20 = vector.broadcast %cst_10 : f32 to vector<8x1xf32>
    %21 = arith.mulf %17, %20 : vector<8x1xf32>
    %22 = arith.mulf %19, %19 : vector<8x1xf32>
    %23 = arith.subf %21, %22 : vector<8x1xf32>
    %cst_11 = arith.constant 0.000000e+00 : f32
    %24 = vector.broadcast %cst_11 : f32 to vector<8x1xf32>
    %25 = arith.maximumf %23, %24 : vector<8x1xf32>
    %cst_12 = arith.constant 1.000000e+00 : f32
    %26 = vector.broadcast %cst_12 : f32 to vector<8x1xf32>
    %27 = arith.addf %26, %10 : vector<8x1xf32>
    %cst_13 = arith.constant 9.99999974E-6 : f32
    %28 = vector.broadcast %cst_13 : f32 to vector<8x1xf32>
    %29 = arith.addf %25, %28 : vector<8x1xf32>
    %30 = math.rsqrt %29 : vector<8x1xf32>
    %31 = arith.mulf %27, %30 : vector<8x1xf32>
    %32 = arith.mulf %19, %31 : vector<8x1xf32>
    %33 = arith.subf %12, %32 : vector<8x1xf32>
    %34 = vector.broadcast %31 : vector<8x1xf32> to vector<8x256xf32>
    %35 = arith.mulf %8, %34 : vector<8x256xf32>
    %36 = vector.broadcast %33 : vector<8x1xf32> to vector<8x256xf32>
    %37 = arith.addf %35, %36 : vector<8x256xf32>
    %cst_14 = arith.constant 0.000000e+00 : f32
    %38 = vector.broadcast %cst_14 : f32 to vector<8x256xf32>
    %39 = arith.maximumf %37, %38 : vector<8x256xf32>
    %c17_i32 = arith.constant 17 : i32
    %40 = tpu.dynamic_rotate %39 by %c17_i32 dim 1 : vector<8x256xf32>, i32 -> vector<8x256xf32>
    %c1_i32 = arith.constant 1 : i32
    %41 = vector.broadcast %c1_i32 : i32 to vector<1x256xi32>
    %42 = arith.cmpi sge, %6, %41 : vector<1x256xi32>
    %43 = arith.andi %2, %42 : vector<1x256xi1>
    %cst_15 = arith.constant 0.000000e+00 : f32
    %44 = vector.broadcast %cst_15 : f32 to vector<8x256xf32>
    %45 = vector.shape_cast %43 : vector<1x256xi1> to vector<1x256xi1>
    %46 = vector.broadcast %45 : vector<1x256xi1> to vector<8x256xi1>
    %47 = arith.select %46, %40, %44 : vector<8x256xi1>, vector<8x256xf32>
    %c0_16 = arith.constant 0 : index
    %c0_17 = arith.constant 0 : index
    %48 = vector.load %arg11[%c0_16, %c0_17] : memref<72x512xf32, #tpu.memory_space<vmem>>, vector<8x256xf32>
    tpu.vector_store %arg11[%c0_16, %c0_17], %47 {strides = array<i32>} : memref<72x512xf32, #tpu.memory_space<vmem>>, vector<8x256xf32>,
    %c16_i32_18 = arith.constant 16 : i32
    %49 = tpu.dynamic_rotate %39 by %c16_i32_18 dim 1 : vector<8x256xf32>, i32 -> vector<8x256xf32>
    %cst_19 = arith.constant 0.000000e+00 : f32
    %50 = vector.broadcast %cst_19 : f32 to vector<8x256xf32>
    %51 = vector.shape_cast %2 : vector<1x256xi1> to vector<1x256xi1>
    %52 = vector.broadcast %51 : vector<1x256xi1> to vector<8x256xi1>
    %53 = arith.select %52, %49, %50 : vector<8x256xi1>, vector<8x256xf32>
    %c8 = arith.constant 8 : index
    %c0_20 = arith.constant 0 : index
    %54 = vector.load %arg11[%c8, %c0_20] : memref<72x512xf32, #tpu.memory_space<vmem>>, vector<8x256xf32>
    tpu.vector_store %arg11[%c8, %c0_20], %53 {strides = array<i32>} : memref<72x512xf32, #tpu.memory_space<vmem>>, vector<8x256xf32>,
    %c15_i32_21 = arith.constant 15 : i32
    %55 = tpu.dynamic_rotate %39 by %c15_i32_21 dim 1 : vector<8x256xf32>, i32 -> vector<8x256xf32>
    %c15_i32_22 = arith.constant 15 : i32
    %56 = vector.broadcast %c15_i32_22 : i32 to vector<1x256xi32>
    %57 = arith.cmpi slt, %6, %56 : vector<1x256xi32>
    %58 = arith.andi %2, %57 : vector<1x256xi1>
    %cst_23 = arith.constant 0.000000e+00 : f32
    %59 = vector.broadcast %cst_23 : f32 to vector<8x256xf32>
    %60 = vector.shape_cast %58 : vector<1x256xi1> to vector<1x256xi1>
    %61 = vector.broadcast %60 : vector<1x256xi1> to vector<8x256xi1>
    %62 = arith.select %61, %55, %59 : vector<8x256xi1>, vector<8x256xf32>
    %c16 = arith.constant 16 : index
    %c0_24 = arith.constant 0 : index
    %63 = vector.load %arg11[%c16, %c0_24] : memref<72x512xf32, #tpu.memory_space<vmem>>, vector<8x256xf32>
    tpu.vector_store %arg11[%c16, %c0_24], %62 {strides = array<i32>} : memref<72x512xf32, #tpu.memory_space<vmem>>, vector<8x256xf32>,
    %c1_i32_25 = arith.constant 1 : i32
    %64 = tpu.dynamic_rotate %39 by %c1_i32_25 dim 1 : vector<8x256xf32>, i32 -> vector<8x256xf32>
    %c1_i32_26 = arith.constant 1 : i32
    %65 = vector.broadcast %c1_i32_26 : i32 to vector<1x256xi32>
    %66 = arith.cmpi sge, %6, %65 : vector<1x256xi32>
    %cst_27 = arith.constant 0.000000e+00 : f32
    %67 = vector.broadcast %cst_27 : f32 to vector<8x256xf32>
    %68 = vector.shape_cast %66 : vector<1x256xi1> to vector<1x256xi1>
    %69 = vector.broadcast %68 : vector<1x256xi1> to vector<8x256xi1>
    %70 = arith.select %69, %64, %67 : vector<8x256xi1>, vector<8x256xf32>
    %c24 = arith.constant 24 : index
    %c0_28 = arith.constant 0 : index
    %71 = vector.load %arg11[%c24, %c0_28] : memref<72x512xf32, #tpu.memory_space<vmem>>, vector<8x256xf32>
    tpu.vector_store %arg11[%c24, %c0_28], %70 {strides = array<i32>} : memref<72x512xf32, #tpu.memory_space<vmem>>, vector<8x256xf32>,
    %c32 = arith.constant 32 : index
    %c0_29 = arith.constant 0 : index
    %72 = vector.load %arg11[%c32, %c0_29] : memref<72x512xf32, #tpu.memory_space<vmem>>, vector<8x256xf32>
    tpu.vector_store %arg11[%c32, %c0_29], %39 {strides = array<i32>} : memref<72x512xf32, #tpu.memory_space<vmem>>, vector<8x256xf32>,
    %c255_i32 = arith.constant 255 : i32
    %73 = tpu.dynamic_rotate %39 by %c255_i32 dim 1 : vector<8x256xf32>, i32 -> vector<8x256xf32>
    %c15_i32_30 = arith.constant 15 : i32
    %74 = vector.broadcast %c15_i32_30 : i32 to vector<1x256xi32>
    %75 = arith.cmpi slt, %6, %74 : vector<1x256xi32>
    %cst_31 = arith.constant 0.000000e+00 : f32
    %76 = vector.broadcast %cst_31 : f32 to vector<8x256xf32>
    %77 = vector.shape_cast %75 : vector<1x256xi1> to vector<1x256xi1>
    %78 = vector.broadcast %77 : vector<1x256xi1> to vector<8x256xi1>
    %79 = arith.select %78, %73, %76 : vector<8x256xi1>, vector<8x256xf32>
    %c40 = arith.constant 40 : index
    %c0_32 = arith.constant 0 : index
    %80 = vector.load %arg11[%c40, %c0_32] : memref<72x512xf32, #tpu.memory_space<vmem>>, vector<8x256xf32>
    tpu.vector_store %arg11[%c40, %c0_32], %79 {strides = array<i32>} : memref<72x512xf32, #tpu.memory_space<vmem>>, vector<8x256xf32>,
    %c241_i32 = arith.constant 241 : i32
    %81 = tpu.dynamic_rotate %39 by %c241_i32 dim 1 : vector<8x256xf32>, i32 -> vector<8x256xf32>
    %c1_i32_33 = arith.constant 1 : i32
    %82 = vector.broadcast %c1_i32_33 : i32 to vector<1x256xi32>
    %83 = arith.cmpi sge, %6, %82 : vector<1x256xi32>
    %84 = arith.andi %4, %83 : vector<1x256xi1>
    %cst_34 = arith.constant 0.000000e+00 : f32
    %85 = vector.broadcast %cst_34 : f32 to vector<8x256xf32>
    %86 = vector.shape_cast %84 : vector<1x256xi1> to vector<1x256xi1>
    %87 = vector.broadcast %86 : vector<1x256xi1> to vector<8x256xi1>
    %88 = arith.select %87, %81, %85 : vector<8x256xi1>, vector<8x256xf32>
    %c48 = arith.constant 48 : index
    %c0_35 = arith.constant 0 : index
    %89 = vector.load %arg11[%c48, %c0_35] : memref<72x512xf32, #tpu.memory_space<vmem>>, vector<8x256xf32>
    tpu.vector_store %arg11[%c48, %c0_35], %88 {strides = array<i32>} : memref<72x512xf32, #tpu.memory_space<vmem>>, vector<8x256xf32>,
    %c240_i32_36 = arith.constant 240 : i32
    %90 = tpu.dynamic_rotate %39 by %c240_i32_36 dim 1 : vector<8x256xf32>, i32 -> vector<8x256xf32>
    %cst_37 = arith.constant 0.000000e+00 : f32
    %91 = vector.broadcast %cst_37 : f32 to vector<8x256xf32>
    %92 = vector.shape_cast %4 : vector<1x256xi1> to vector<1x256xi1>
    %93 = vector.broadcast %92 : vector<1x256xi1> to vector<8x256xi1>
    %94 = arith.select %93, %90, %91 : vector<8x256xi1>, vector<8x256xf32>
    %c56 = arith.constant 56 : index
    %c0_38 = arith.constant 0 : index
    %95 = vector.load %arg11[%c56, %c0_38] : memref<72x512xf32, #tpu.memory_space<vmem>>, vector<8x256xf32>
    tpu.vector_store %arg11[%c56, %c0_38], %94 {strides = array<i32>} : memref<72x512xf32, #tpu.memory_space<vmem>>, vector<8x256xf32>,
    %c239_i32 = arith.constant 239 : i32
    %96 = tpu.dynamic_rotate %39 by %c239_i32 dim 1 : vector<8x256xf32>, i32 -> vector<8x256xf32>
    %c15_i32_39 = arith.constant 15 : i32
    %97 = vector.broadcast %c15_i32_39 : i32 to vector<1x256xi32>
    %98 = arith.cmpi slt, %6, %97 : vector<1x256xi32>
    %99 = arith.andi %4, %98 : vector<1x256xi1>
    %cst_40 = arith.constant 0.000000e+00 : f32
    %100 = vector.broadcast %cst_40 : f32 to vector<8x256xf32>
    %101 = vector.shape_cast %99 : vector<1x256xi1> to vector<1x256xi1>
    %102 = vector.broadcast %101 : vector<1x256xi1> to vector<8x256xi1>
    %103 = arith.select %102, %96, %100 : vector<8x256xi1>, vector<8x256xf32>
    %c64 = arith.constant 64 : index
    %c0_41 = arith.constant 0 : index
    %104 = vector.load %arg11[%c64, %c0_41] : memref<72x512xf32, #tpu.memory_space<vmem>>, vector<8x256xf32>
    tpu.vector_store %arg11[%c64, %c0_41], %103 {strides = array<i32>} : memref<72x512xf32, #tpu.memory_space<vmem>>, vector<8x256xf32>,
    %c1 = arith.constant 1 : index
    %c0_42 = arith.constant 0 : index
    %c0_43 = arith.constant 0 : index
    %105 = vector.load %arg1[%c1, %c0_42, %c0_43] : memref<2x8x256xf32, #tpu.memory_space<vmem>>, vector<1x8x256xf32>
    %106 = vector.shape_cast %105 : vector<1x8x256xf32> to vector<8x256xf32>
    %c1_44 = arith.constant 1 : index
    %c0_45 = arith.constant 0 : index
    %c0_46 = arith.constant 0 : index
    %107 = vector.load %arg2[%c1_44, %c0_45, %c0_46] : memref<2x8x1xf32, #tpu.memory_space<vmem>>, vector<1x8x1xf32>
    %108 = vector.shape_cast %107 : vector<1x8x1xf32> to vector<8x1xf32>
    %c1_47 = arith.constant 1 : index
    %c0_48 = arith.constant 0 : index
    %c0_49 = arith.constant 0 : index
    %109 = vector.load %arg3[%c1_47, %c0_48, %c0_49] : memref<2x8x1xf32, #tpu.memory_space<vmem>>, vector<1x8x1xf32>
    %110 = vector.shape_cast %109 : vector<1x8x1xf32> to vector<8x1xf32>
    %cst_50 = arith.constant dense<0.000000e+00> : vector<8xf32>
    %111 = vector.multi_reduction <add>, %106, %cst_50 [1] : vector<8x256xf32> to vector<8xf32>
    %112 = vector.shape_cast %111 : vector<8xf32> to vector<8x1xf32>
    %113 = arith.mulf %106, %106 : vector<8x256xf32>
    %cst_51 = arith.constant dense<0.000000e+00> : vector<8xf32>
    %114 = vector.multi_reduction <add>, %113, %cst_51 [1] : vector<8x256xf32> to vector<8xf32>
    %115 = vector.shape_cast %114 : vector<8xf32> to vector<8x1xf32>
    %cst_52 = arith.constant 3.906250e-03 : f32
    %116 = vector.broadcast %cst_52 : f32 to vector<8x1xf32>
    %117 = arith.mulf %112, %116 : vector<8x1xf32>
    %cst_53 = arith.constant 3.906250e-03 : f32
    %118 = vector.broadcast %cst_53 : f32 to vector<8x1xf32>
    %119 = arith.mulf %115, %118 : vector<8x1xf32>
    %120 = arith.mulf %117, %117 : vector<8x1xf32>
    %121 = arith.subf %119, %120 : vector<8x1xf32>
    %cst_54 = arith.constant 0.000000e+00 : f32
    %122 = vector.broadcast %cst_54 : f32 to vector<8x1xf32>
    %123 = arith.maximumf %121, %122 : vector<8x1xf32>
    %cst_55 = arith.constant 1.000000e+00 : f32
    %124 = vector.broadcast %cst_55 : f32 to vector<8x1xf32>
    %125 = arith.addf %124, %108 : vector<8x1xf32>
    %cst_56 = arith.constant 9.99999974E-6 : f32
    %126 = vector.broadcast %cst_56 : f32 to vector<8x1xf32>
    %127 = arith.addf %123, %126 : vector<8x1xf32>
    %128 = math.rsqrt %127 : vector<8x1xf32>
    %129 = arith.mulf %125, %128 : vector<8x1xf32>
    %130 = arith.mulf %117, %129 : vector<8x1xf32>
    %131 = arith.subf %110, %130 : vector<8x1xf32>
    %132 = vector.broadcast %129 : vector<8x1xf32> to vector<8x256xf32>
    %133 = arith.mulf %106, %132 : vector<8x256xf32>
    %134 = vector.broadcast %131 : vector<8x1xf32> to vector<8x256xf32>
    %135 = arith.addf %133, %134 : vector<8x256xf32>
    %cst_57 = arith.constant 0.000000e+00 : f32
    %136 = vector.broadcast %cst_57 : f32 to vector<8x256xf32>
    %137 = arith.maximumf %135, %136 : vector<8x256xf32>
    %c17_i32_58 = arith.constant 17 : i32
    %138 = tpu.dynamic_rotate %137 by %c17_i32_58 dim 1 : vector<8x256xf32>, i32 -> vector<8x256xf32>
    %c1_i32_59 = arith.constant 1 : i32
    %139 = vector.broadcast %c1_i32_59 : i32 to vector<1x256xi32>
    %140 = arith.cmpi sge, %6, %139 : vector<1x256xi32>
    %141 = arith.andi %2, %140 : vector<1x256xi1>
    %cst_60 = arith.constant 0.000000e+00 : f32
    %142 = vector.broadcast %cst_60 : f32 to vector<8x256xf32>
    %143 = vector.shape_cast %141 : vector<1x256xi1> to vector<1x256xi1>
    %144 = vector.broadcast %143 : vector<1x256xi1> to vector<8x256xi1>
    %145 = arith.select %144, %138, %142 : vector<8x256xi1>, vector<8x256xf32>
    %c0_61 = arith.constant 0 : index
    %c256 = arith.constant 256 : index
    %146 = vector.load %arg11[%c0_61, %c256] : memref<72x512xf32, #tpu.memory_space<vmem>>, vector<8x256xf32>
    tpu.vector_store %arg11[%c0_61, %c256], %145 {strides = array<i32>} : memref<72x512xf32, #tpu.memory_space<vmem>>, vector<8x256xf32>,
    %c16_i32_62 = arith.constant 16 : i32
    %147 = tpu.dynamic_rotate %137 by %c16_i32_62 dim 1 : vector<8x256xf32>, i32 -> vector<8x256xf32>
    %cst_63 = arith.constant 0.000000e+00 : f32
    %148 = vector.broadcast %cst_63 : f32 to vector<8x256xf32>
    %149 = vector.shape_cast %2 : vector<1x256xi1> to vector<1x256xi1>
    %150 = vector.broadcast %149 : vector<1x256xi1> to vector<8x256xi1>
    %151 = arith.select %150, %147, %148 : vector<8x256xi1>, vector<8x256xf32>
    %c8_64 = arith.constant 8 : index
    %c256_65 = arith.constant 256 : index
    %152 = vector.load %arg11[%c8_64, %c256_65] : memref<72x512xf32, #tpu.memory_space<vmem>>, vector<8x256xf32>
    tpu.vector_store %arg11[%c8_64, %c256_65], %151 {strides = array<i32>} : memref<72x512xf32, #tpu.memory_space<vmem>>, vector<8x256xf32>,
    %c15_i32_66 = arith.constant 15 : i32
    %153 = tpu.dynamic_rotate %137 by %c15_i32_66 dim 1 : vector<8x256xf32>, i32 -> vector<8x256xf32>
    %c15_i32_67 = arith.constant 15 : i32
    %154 = vector.broadcast %c15_i32_67 : i32 to vector<1x256xi32>
    %155 = arith.cmpi slt, %6, %154 : vector<1x256xi32>
    %156 = arith.andi %2, %155 : vector<1x256xi1>
    %cst_68 = arith.constant 0.000000e+00 : f32
    %157 = vector.broadcast %cst_68 : f32 to vector<8x256xf32>
    %158 = vector.shape_cast %156 : vector<1x256xi1> to vector<1x256xi1>
    %159 = vector.broadcast %158 : vector<1x256xi1> to vector<8x256xi1>
    %160 = arith.select %159, %153, %157 : vector<8x256xi1>, vector<8x256xf32>
    %c16_69 = arith.constant 16 : index
    %c256_70 = arith.constant 256 : index
    %161 = vector.load %arg11[%c16_69, %c256_70] : memref<72x512xf32, #tpu.memory_space<vmem>>, vector<8x256xf32>
    tpu.vector_store %arg11[%c16_69, %c256_70], %160 {strides = array<i32>} : memref<72x512xf32, #tpu.memory_space<vmem>>, vector<8x256xf32>,
    %c1_i32_71 = arith.constant 1 : i32
    %162 = tpu.dynamic_rotate %137 by %c1_i32_71 dim 1 : vector<8x256xf32>, i32 -> vector<8x256xf32>
    %c1_i32_72 = arith.constant 1 : i32
    %163 = vector.broadcast %c1_i32_72 : i32 to vector<1x256xi32>
    %164 = arith.cmpi sge, %6, %163 : vector<1x256xi32>
    %cst_73 = arith.constant 0.000000e+00 : f32
    %165 = vector.broadcast %cst_73 : f32 to vector<8x256xf32>
    %166 = vector.shape_cast %164 : vector<1x256xi1> to vector<1x256xi1>
    %167 = vector.broadcast %166 : vector<1x256xi1> to vector<8x256xi1>
    %168 = arith.select %167, %162, %165 : vector<8x256xi1>, vector<8x256xf32>
    %c24_74 = arith.constant 24 : index
    %c256_75 = arith.constant 256 : index
    %169 = vector.load %arg11[%c24_74, %c256_75] : memref<72x512xf32, #tpu.memory_space<vmem>>, vector<8x256xf32>
    tpu.vector_store %arg11[%c24_74, %c256_75], %168 {strides = array<i32>} : memref<72x512xf32, #tpu.memory_space<vmem>>, vector<8x256xf32>,
    %c32_76 = arith.constant 32 : index
    %c256_77 = arith.constant 256 : index
    %170 = vector.load %arg11[%c32_76, %c256_77] : memref<72x512xf32, #tpu.memory_space<vmem>>, vector<8x256xf32>
    tpu.vector_store %arg11[%c32_76, %c256_77], %137 {strides = array<i32>} : memref<72x512xf32, #tpu.memory_space<vmem>>, vector<8x256xf32>,
    %c255_i32_78 = arith.constant 255 : i32
    %171 = tpu.dynamic_rotate %137 by %c255_i32_78 dim 1 : vector<8x256xf32>, i32 -> vector<8x256xf32>
    %c15_i32_79 = arith.constant 15 : i32
    %172 = vector.broadcast %c15_i32_79 : i32 to vector<1x256xi32>
    %173 = arith.cmpi slt, %6, %172 : vector<1x256xi32>
    %cst_80 = arith.constant 0.000000e+00 : f32
    %174 = vector.broadcast %cst_80 : f32 to vector<8x256xf32>
    %175 = vector.shape_cast %173 : vector<1x256xi1> to vector<1x256xi1>
    %176 = vector.broadcast %175 : vector<1x256xi1> to vector<8x256xi1>
    %177 = arith.select %176, %171, %174 : vector<8x256xi1>, vector<8x256xf32>
    %c40_81 = arith.constant 40 : index
    %c256_82 = arith.constant 256 : index
    %178 = vector.load %arg11[%c40_81, %c256_82] : memref<72x512xf32, #tpu.memory_space<vmem>>, vector<8x256xf32>
    tpu.vector_store %arg11[%c40_81, %c256_82], %177 {strides = array<i32>} : memref<72x512xf32, #tpu.memory_space<vmem>>, vector<8x256xf32>,
    %c241_i32_83 = arith.constant 241 : i32
    %179 = tpu.dynamic_rotate %137 by %c241_i32_83 dim 1 : vector<8x256xf32>, i32 -> vector<8x256xf32>
    %c1_i32_84 = arith.constant 1 : i32
    %180 = vector.broadcast %c1_i32_84 : i32 to vector<1x256xi32>
    %181 = arith.cmpi sge, %6, %180 : vector<1x256xi32>
    %182 = arith.andi %4, %181 : vector<1x256xi1>
    %cst_85 = arith.constant 0.000000e+00 : f32
    %183 = vector.broadcast %cst_85 : f32 to vector<8x256xf32>
    %184 = vector.shape_cast %182 : vector<1x256xi1> to vector<1x256xi1>
    %185 = vector.broadcast %184 : vector<1x256xi1> to vector<8x256xi1>
    %186 = arith.select %185, %179, %183 : vector<8x256xi1>, vector<8x256xf32>
    %c48_86 = arith.constant 48 : index
    %c256_87 = arith.constant 256 : index
    %187 = vector.load %arg11[%c48_86, %c256_87] : memref<72x512xf32, #tpu.memory_space<vmem>>, vector<8x256xf32>
    tpu.vector_store %arg11[%c48_86, %c256_87], %186 {strides = array<i32>} : memref<72x512xf32, #tpu.memory_space<vmem>>, vector<8x256xf32>,
    %c240_i32_88 = arith.constant 240 : i32
    %188 = tpu.dynamic_rotate %137 by %c240_i32_88 dim 1 : vector<8x256xf32>, i32 -> vector<8x256xf32>
    %cst_89 = arith.constant 0.000000e+00 : f32
    %189 = vector.broadcast %cst_89 : f32 to vector<8x256xf32>
    %190 = vector.shape_cast %4 : vector<1x256xi1> to vector<1x256xi1>
    %191 = vector.broadcast %190 : vector<1x256xi1> to vector<8x256xi1>
    %192 = arith.select %191, %188, %189 : vector<8x256xi1>, vector<8x256xf32>
    %c56_90 = arith.constant 56 : index
    %c256_91 = arith.constant 256 : index
    %193 = vector.load %arg11[%c56_90, %c256_91] : memref<72x512xf32, #tpu.memory_space<vmem>>, vector<8x256xf32>
    tpu.vector_store %arg11[%c56_90, %c256_91], %192 {strides = array<i32>} : memref<72x512xf32, #tpu.memory_space<vmem>>, vector<8x256xf32>,
    %c239_i32_92 = arith.constant 239 : i32
    %194 = tpu.dynamic_rotate %137 by %c239_i32_92 dim 1 : vector<8x256xf32>, i32 -> vector<8x256xf32>
    %c15_i32_93 = arith.constant 15 : i32
    %195 = vector.broadcast %c15_i32_93 : i32 to vector<1x256xi32>
    %196 = arith.cmpi slt, %6, %195 : vector<1x256xi32>
    %197 = arith.andi %4, %196 : vector<1x256xi1>
    %cst_94 = arith.constant 0.000000e+00 : f32
    %198 = vector.broadcast %cst_94 : f32 to vector<8x256xf32>
    %199 = vector.shape_cast %197 : vector<1x256xi1> to vector<1x256xi1>
    %200 = vector.broadcast %199 : vector<1x256xi1> to vector<8x256xi1>
    %201 = arith.select %200, %194, %198 : vector<8x256xi1>, vector<8x256xf32>
    %c64_95 = arith.constant 64 : index
    %c256_96 = arith.constant 256 : index
    %202 = vector.load %arg11[%c64_95, %c256_96] : memref<72x512xf32, #tpu.memory_space<vmem>>, vector<8x256xf32>
    tpu.vector_store %arg11[%c64_95, %c256_96], %201 {strides = array<i32>} : memref<72x512xf32, #tpu.memory_space<vmem>>, vector<8x256xf32>,
    %c0_97 = arith.constant 0 : index
    %c0_98 = arith.constant 0 : index
    %203 = vector.load %arg6[%c0_97, %c0_98] : memref<8x72xbf16, #tpu.memory_space<vmem>>, vector<8x72xbf16>
    %c0_99 = arith.constant 0 : index
    %c0_100 = arith.constant 0 : index
    %204 = vector.load %arg11[%c0_99, %c0_100] : memref<72x512xf32, #tpu.memory_space<vmem>>, vector<72x512xf32>
    %205 = arith.truncf %204 : vector<72x512xf32> to vector<72x512xbf16>
    %cst_101 = arith.constant dense<0.000000e+00> : vector<8x512xf32>
    %206 = tpu.matmul %203, %205, %cst_101 {dimension_numbers = #tpu.dot_dimension_numbers<[1], [0], [0], [1], [0, 0, 1, 1], [], []>} : vector<8x72xbf16>, vector<72x512xbf16>, vector<8x512xf32> -> vector<8x512xf32>
    %c0_102 = arith.constant 0 : index
    %c0_103 = arith.constant 0 : index
    %207 = vector.load %arg7[%c0_102, %c0_103] : memref<8x1xf32, #tpu.memory_space<vmem>>, vector<8x1xf32>
    %208 = vector.broadcast %207 : vector<8x1xf32> to vector<8x512xf32>
    %209 = arith.addf %206, %208 : vector<8x512xf32>
    %210 = vector.extract_strided_slice %209 {offsets = [0, 0], sizes = [8, 256], strides = [1, 1]} : vector<8x512xf32> to vector<8x256xf32>
    %c0_104 = arith.constant 0 : index
    %c0_105 = arith.constant 0 : index
    %c0_106 = arith.constant 0 : index
    %211 = vector.load %arg4[%c0_104, %c0_105, %c0_106] : memref<2x8x1xf32, #tpu.memory_space<vmem>>, vector<1x8x1xf32>
    %212 = vector.shape_cast %211 : vector<1x8x1xf32> to vector<8x1xf32>
    %c0_107 = arith.constant 0 : index
    %c0_108 = arith.constant 0 : index
    %c0_109 = arith.constant 0 : index
    %213 = vector.load %arg5[%c0_107, %c0_108, %c0_109] : memref<2x8x1xf32, #tpu.memory_space<vmem>>, vector<1x8x1xf32>
    %214 = vector.shape_cast %213 : vector<1x8x1xf32> to vector<8x1xf32>
    %cst_110 = arith.constant dense<0.000000e+00> : vector<8xf32>
    %215 = vector.multi_reduction <add>, %210, %cst_110 [1] : vector<8x256xf32> to vector<8xf32>
    %216 = vector.shape_cast %215 : vector<8xf32> to vector<8x1xf32>
    %217 = arith.mulf %210, %210 : vector<8x256xf32>
    %cst_111 = arith.constant dense<0.000000e+00> : vector<8xf32>
    %218 = vector.multi_reduction <add>, %217, %cst_111 [1] : vector<8x256xf32> to vector<8xf32>
    %219 = vector.shape_cast %218 : vector<8xf32> to vector<8x1xf32>
    %cst_112 = arith.constant 3.906250e-03 : f32
    %220 = vector.broadcast %cst_112 : f32 to vector<8x1xf32>
    %221 = arith.mulf %216, %220 : vector<8x1xf32>
    %cst_113 = arith.constant 3.906250e-03 : f32
    %222 = vector.broadcast %cst_113 : f32 to vector<8x1xf32>
    %223 = arith.mulf %219, %222 : vector<8x1xf32>
    %224 = arith.mulf %221, %221 : vector<8x1xf32>
    %225 = arith.subf %223, %224 : vector<8x1xf32>
    %cst_114 = arith.constant 0.000000e+00 : f32
    %226 = vector.broadcast %cst_114 : f32 to vector<8x1xf32>
    %227 = arith.maximumf %225, %226 : vector<8x1xf32>
    %cst_115 = arith.constant 1.000000e+00 : f32
    %228 = vector.broadcast %cst_115 : f32 to vector<8x1xf32>
    %229 = arith.addf %228, %212 : vector<8x1xf32>
    %cst_116 = arith.constant 9.99999974E-6 : f32
    %230 = vector.broadcast %cst_116 : f32 to vector<8x1xf32>
    %231 = arith.addf %227, %230 : vector<8x1xf32>
    %232 = math.rsqrt %231 : vector<8x1xf32>
    %233 = arith.mulf %229, %232 : vector<8x1xf32>
    %234 = arith.mulf %221, %233 : vector<8x1xf32>
    %235 = arith.subf %214, %234 : vector<8x1xf32>
    %236 = vector.broadcast %233 : vector<8x1xf32> to vector<8x256xf32>
    %237 = arith.mulf %210, %236 : vector<8x256xf32>
    %238 = vector.broadcast %235 : vector<8x1xf32> to vector<8x256xf32>
    %239 = arith.addf %237, %238 : vector<8x256xf32>
    %cst_117 = arith.constant 0.000000e+00 : f32
    %240 = vector.broadcast %cst_117 : f32 to vector<8x256xf32>
    %241 = arith.maximumf %239, %240 : vector<8x256xf32>
    %c17_i32_118 = arith.constant 17 : i32
    %242 = tpu.dynamic_rotate %241 by %c17_i32_118 dim 1 : vector<8x256xf32>, i32 -> vector<8x256xf32>
    %c1_i32_119 = arith.constant 1 : i32
    %243 = vector.broadcast %c1_i32_119 : i32 to vector<1x256xi32>
    %244 = arith.cmpi sge, %6, %243 : vector<1x256xi32>
    %245 = arith.andi %2, %244 : vector<1x256xi1>
    %cst_120 = arith.constant 0.000000e+00 : f32
    %246 = vector.broadcast %cst_120 : f32 to vector<8x256xf32>
    %247 = vector.shape_cast %245 : vector<1x256xi1> to vector<1x256xi1>
    %248 = vector.broadcast %247 : vector<1x256xi1> to vector<8x256xi1>
    %249 = arith.select %248, %242, %246 : vector<8x256xi1>, vector<8x256xf32>
    %c0_121 = arith.constant 0 : index
    %c0_122 = arith.constant 0 : index
    %250 = vector.load %arg11[%c0_121, %c0_122] : memref<72x512xf32, #tpu.memory_space<vmem>>, vector<8x256xf32>
    tpu.vector_store %arg11[%c0_121, %c0_122], %249 {strides = array<i32>} : memref<72x512xf32, #tpu.memory_space<vmem>>, vector<8x256xf32>,
    %c16_i32_123 = arith.constant 16 : i32
    %251 = tpu.dynamic_rotate %241 by %c16_i32_123 dim 1 : vector<8x256xf32>, i32 -> vector<8x256xf32>
    %cst_124 = arith.constant 0.000000e+00 : f32
    %252 = vector.broadcast %cst_124 : f32 to vector<8x256xf32>
    %253 = vector.shape_cast %2 : vector<1x256xi1> to vector<1x256xi1>
    %254 = vector.broadcast %253 : vector<1x256xi1> to vector<8x256xi1>
    %255 = arith.select %254, %251, %252 : vector<8x256xi1>, vector<8x256xf32>
    %c8_125 = arith.constant 8 : index
    %c0_126 = arith.constant 0 : index
    %256 = vector.load %arg11[%c8_125, %c0_126] : memref<72x512xf32, #tpu.memory_space<vmem>>, vector<8x256xf32>
    tpu.vector_store %arg11[%c8_125, %c0_126], %255 {strides = array<i32>} : memref<72x512xf32, #tpu.memory_space<vmem>>, vector<8x256xf32>,
    %c15_i32_127 = arith.constant 15 : i32
    %257 = tpu.dynamic_rotate %241 by %c15_i32_127 dim 1 : vector<8x256xf32>, i32 -> vector<8x256xf32>
    %c15_i32_128 = arith.constant 15 : i32
    %258 = vector.broadcast %c15_i32_128 : i32 to vector<1x256xi32>
    %259 = arith.cmpi slt, %6, %258 : vector<1x256xi32>
    %260 = arith.andi %2, %259 : vector<1x256xi1>
    %cst_129 = arith.constant 0.000000e+00 : f32
    %261 = vector.broadcast %cst_129 : f32 to vector<8x256xf32>
    %262 = vector.shape_cast %260 : vector<1x256xi1> to vector<1x256xi1>
    %263 = vector.broadcast %262 : vector<1x256xi1> to vector<8x256xi1>
    %264 = arith.select %263, %257, %261 : vector<8x256xi1>, vector<8x256xf32>
    %c16_130 = arith.constant 16 : index
    %c0_131 = arith.constant 0 : index
    %265 = vector.load %arg11[%c16_130, %c0_131] : memref<72x512xf32, #tpu.memory_space<vmem>>, vector<8x256xf32>
    tpu.vector_store %arg11[%c16_130, %c0_131], %264 {strides = array<i32>} : memref<72x512xf32, #tpu.memory_space<vmem>>, vector<8x256xf32>,
    %c1_i32_132 = arith.constant 1 : i32
    %266 = tpu.dynamic_rotate %241 by %c1_i32_132 dim 1 : vector<8x256xf32>, i32 -> vector<8x256xf32>
    %c1_i32_133 = arith.constant 1 : i32
    %267 = vector.broadcast %c1_i32_133 : i32 to vector<1x256xi32>
    %268 = arith.cmpi sge, %6, %267 : vector<1x256xi32>
    %cst_134 = arith.constant 0.000000e+00 : f32
    %269 = vector.broadcast %cst_134 : f32 to vector<8x256xf32>
    %270 = vector.shape_cast %268 : vector<1x256xi1> to vector<1x256xi1>
    %271 = vector.broadcast %270 : vector<1x256xi1> to vector<8x256xi1>
    %272 = arith.select %271, %266, %269 : vector<8x256xi1>, vector<8x256xf32>
    %c24_135 = arith.constant 24 : index
    %c0_136 = arith.constant 0 : index
    %273 = vector.load %arg11[%c24_135, %c0_136] : memref<72x512xf32, #tpu.memory_space<vmem>>, vector<8x256xf32>
    tpu.vector_store %arg11[%c24_135, %c0_136], %272 {strides = array<i32>} : memref<72x512xf32, #tpu.memory_space<vmem>>, vector<8x256xf32>,
    %c32_137 = arith.constant 32 : index
    %c0_138 = arith.constant 0 : index
    %274 = vector.load %arg11[%c32_137, %c0_138] : memref<72x512xf32, #tpu.memory_space<vmem>>, vector<8x256xf32>
    tpu.vector_store %arg11[%c32_137, %c0_138], %241 {strides = array<i32>} : memref<72x512xf32, #tpu.memory_space<vmem>>, vector<8x256xf32>,
    %c255_i32_139 = arith.constant 255 : i32
    %275 = tpu.dynamic_rotate %241 by %c255_i32_139 dim 1 : vector<8x256xf32>, i32 -> vector<8x256xf32>
    %c15_i32_140 = arith.constant 15 : i32
    %276 = vector.broadcast %c15_i32_140 : i32 to vector<1x256xi32>
    %277 = arith.cmpi slt, %6, %276 : vector<1x256xi32>
    %cst_141 = arith.constant 0.000000e+00 : f32
    %278 = vector.broadcast %cst_141 : f32 to vector<8x256xf32>
    %279 = vector.shape_cast %277 : vector<1x256xi1> to vector<1x256xi1>
    %280 = vector.broadcast %279 : vector<1x256xi1> to vector<8x256xi1>
    %281 = arith.select %280, %275, %278 : vector<8x256xi1>, vector<8x256xf32>
    %c40_142 = arith.constant 40 : index
    %c0_143 = arith.constant 0 : index
    %282 = vector.load %arg11[%c40_142, %c0_143] : memref<72x512xf32, #tpu.memory_space<vmem>>, vector<8x256xf32>
    tpu.vector_store %arg11[%c40_142, %c0_143], %281 {strides = array<i32>} : memref<72x512xf32, #tpu.memory_space<vmem>>, vector<8x256xf32>,
    %c241_i32_144 = arith.constant 241 : i32
    %283 = tpu.dynamic_rotate %241 by %c241_i32_144 dim 1 : vector<8x256xf32>, i32 -> vector<8x256xf32>
    %c1_i32_145 = arith.constant 1 : i32
    %284 = vector.broadcast %c1_i32_145 : i32 to vector<1x256xi32>
    %285 = arith.cmpi sge, %6, %284 : vector<1x256xi32>
    %286 = arith.andi %4, %285 : vector<1x256xi1>
    %cst_146 = arith.constant 0.000000e+00 : f32
    %287 = vector.broadcast %cst_146 : f32 to vector<8x256xf32>
    %288 = vector.shape_cast %286 : vector<1x256xi1> to vector<1x256xi1>
    %289 = vector.broadcast %288 : vector<1x256xi1> to vector<8x256xi1>
    %290 = arith.select %289, %283, %287 : vector<8x256xi1>, vector<8x256xf32>
    %c48_147 = arith.constant 48 : index
    %c0_148 = arith.constant 0 : index
    %291 = vector.load %arg11[%c48_147, %c0_148] : memref<72x512xf32, #tpu.memory_space<vmem>>, vector<8x256xf32>
    tpu.vector_store %arg11[%c48_147, %c0_148], %290 {strides = array<i32>} : memref<72x512xf32, #tpu.memory_space<vmem>>, vector<8x256xf32>,
    %c240_i32_149 = arith.constant 240 : i32
    %292 = tpu.dynamic_rotate %241 by %c240_i32_149 dim 1 : vector<8x256xf32>, i32 -> vector<8x256xf32>
    %cst_150 = arith.constant 0.000000e+00 : f32
    %293 = vector.broadcast %cst_150 : f32 to vector<8x256xf32>
    %294 = vector.shape_cast %4 : vector<1x256xi1> to vector<1x256xi1>
    %295 = vector.broadcast %294 : vector<1x256xi1> to vector<8x256xi1>
    %296 = arith.select %295, %292, %293 : vector<8x256xi1>, vector<8x256xf32>
    %c56_151 = arith.constant 56 : index
    %c0_152 = arith.constant 0 : index
    %297 = vector.load %arg11[%c56_151, %c0_152] : memref<72x512xf32, #tpu.memory_space<vmem>>, vector<8x256xf32>
    tpu.vector_store %arg11[%c56_151, %c0_152], %296 {strides = array<i32>} : memref<72x512xf32, #tpu.memory_space<vmem>>, vector<8x256xf32>,
    %c239_i32_153 = arith.constant 239 : i32
    %298 = tpu.dynamic_rotate %241 by %c239_i32_153 dim 1 : vector<8x256xf32>, i32 -> vector<8x256xf32>
    %c15_i32_154 = arith.constant 15 : i32
    %299 = vector.broadcast %c15_i32_154 : i32 to vector<1x256xi32>
    %300 = arith.cmpi slt, %6, %299 : vector<1x256xi32>
    %301 = arith.andi %4, %300 : vector<1x256xi1>
    %cst_155 = arith.constant 0.000000e+00 : f32
    %302 = vector.broadcast %cst_155 : f32 to vector<8x256xf32>
    %303 = vector.shape_cast %301 : vector<1x256xi1> to vector<1x256xi1>
    %304 = vector.broadcast %303 : vector<1x256xi1> to vector<8x256xi1>
    %305 = arith.select %304, %298, %302 : vector<8x256xi1>, vector<8x256xf32>
    %c64_156 = arith.constant 64 : index
    %c0_157 = arith.constant 0 : index
    %306 = vector.load %arg11[%c64_156, %c0_157] : memref<72x512xf32, #tpu.memory_space<vmem>>, vector<8x256xf32>
    tpu.vector_store %arg11[%c64_156, %c0_157], %305 {strides = array<i32>} : memref<72x512xf32, #tpu.memory_space<vmem>>, vector<8x256xf32>,
    %307 = vector.extract_strided_slice %209 {offsets = [0, 256], sizes = [8, 256], strides = [1, 1]} : vector<8x512xf32> to vector<8x256xf32>
    %c1_158 = arith.constant 1 : index
    %c0_159 = arith.constant 0 : index
    %c0_160 = arith.constant 0 : index
    %308 = vector.load %arg4[%c1_158, %c0_159, %c0_160] : memref<2x8x1xf32, #tpu.memory_space<vmem>>, vector<1x8x1xf32>
    %309 = vector.shape_cast %308 : vector<1x8x1xf32> to vector<8x1xf32>
    %c1_161 = arith.constant 1 : index
    %c0_162 = arith.constant 0 : index
    %c0_163 = arith.constant 0 : index
    %310 = vector.load %arg5[%c1_161, %c0_162, %c0_163] : memref<2x8x1xf32, #tpu.memory_space<vmem>>, vector<1x8x1xf32>
    %311 = vector.shape_cast %310 : vector<1x8x1xf32> to vector<8x1xf32>
    %cst_164 = arith.constant dense<0.000000e+00> : vector<8xf32>
    %312 = vector.multi_reduction <add>, %307, %cst_164 [1] : vector<8x256xf32> to vector<8xf32>
    %313 = vector.shape_cast %312 : vector<8xf32> to vector<8x1xf32>
    %314 = arith.mulf %307, %307 : vector<8x256xf32>
    %cst_165 = arith.constant dense<0.000000e+00> : vector<8xf32>
    %315 = vector.multi_reduction <add>, %314, %cst_165 [1] : vector<8x256xf32> to vector<8xf32>
    %316 = vector.shape_cast %315 : vector<8xf32> to vector<8x1xf32>
    %cst_166 = arith.constant 3.906250e-03 : f32
    %317 = vector.broadcast %cst_166 : f32 to vector<8x1xf32>
    %318 = arith.mulf %313, %317 : vector<8x1xf32>
    %cst_167 = arith.constant 3.906250e-03 : f32
    %319 = vector.broadcast %cst_167 : f32 to vector<8x1xf32>
    %320 = arith.mulf %316, %319 : vector<8x1xf32>
    %321 = arith.mulf %318, %318 : vector<8x1xf32>
    %322 = arith.subf %320, %321 : vector<8x1xf32>
    %cst_168 = arith.constant 0.000000e+00 : f32
    %323 = vector.broadcast %cst_168 : f32 to vector<8x1xf32>
    %324 = arith.maximumf %322, %323 : vector<8x1xf32>
    %cst_169 = arith.constant 1.000000e+00 : f32
    %325 = vector.broadcast %cst_169 : f32 to vector<8x1xf32>
    %326 = arith.addf %325, %309 : vector<8x1xf32>
    %cst_170 = arith.constant 9.99999974E-6 : f32
    %327 = vector.broadcast %cst_170 : f32 to vector<8x1xf32>
    %328 = arith.addf %324, %327 : vector<8x1xf32>
    %329 = math.rsqrt %328 : vector<8x1xf32>
    %330 = arith.mulf %326, %329 : vector<8x1xf32>
    %331 = arith.mulf %318, %330 : vector<8x1xf32>
    %332 = arith.subf %311, %331 : vector<8x1xf32>
    %333 = vector.broadcast %330 : vector<8x1xf32> to vector<8x256xf32>
    %334 = arith.mulf %307, %333 : vector<8x256xf32>
    %335 = vector.broadcast %332 : vector<8x1xf32> to vector<8x256xf32>
    %336 = arith.addf %334, %335 : vector<8x256xf32>
    %cst_171 = arith.constant 0.000000e+00 : f32
    %337 = vector.broadcast %cst_171 : f32 to vector<8x256xf32>
    %338 = arith.maximumf %336, %337 : vector<8x256xf32>
    %c17_i32_172 = arith.constant 17 : i32
    %339 = tpu.dynamic_rotate %338 by %c17_i32_172 dim 1 : vector<8x256xf32>, i32 -> vector<8x256xf32>
    %c1_i32_173 = arith.constant 1 : i32
    %340 = vector.broadcast %c1_i32_173 : i32 to vector<1x256xi32>
    %341 = arith.cmpi sge, %6, %340 : vector<1x256xi32>
    %342 = arith.andi %2, %341 : vector<1x256xi1>
    %cst_174 = arith.constant 0.000000e+00 : f32
    %343 = vector.broadcast %cst_174 : f32 to vector<8x256xf32>
    %344 = vector.shape_cast %342 : vector<1x256xi1> to vector<1x256xi1>
    %345 = vector.broadcast %344 : vector<1x256xi1> to vector<8x256xi1>
    %346 = arith.select %345, %339, %343 : vector<8x256xi1>, vector<8x256xf32>
    %c0_175 = arith.constant 0 : index
    %c256_176 = arith.constant 256 : index
    %347 = vector.load %arg11[%c0_175, %c256_176] : memref<72x512xf32, #tpu.memory_space<vmem>>, vector<8x256xf32>
    tpu.vector_store %arg11[%c0_175, %c256_176], %346 {strides = array<i32>} : memref<72x512xf32, #tpu.memory_space<vmem>>, vector<8x256xf32>,
    %c16_i32_177 = arith.constant 16 : i32
    %348 = tpu.dynamic_rotate %338 by %c16_i32_177 dim 1 : vector<8x256xf32>, i32 -> vector<8x256xf32>
    %cst_178 = arith.constant 0.000000e+00 : f32
    %349 = vector.broadcast %cst_178 : f32 to vector<8x256xf32>
    %350 = vector.shape_cast %2 : vector<1x256xi1> to vector<1x256xi1>
    %351 = vector.broadcast %350 : vector<1x256xi1> to vector<8x256xi1>
    %352 = arith.select %351, %348, %349 : vector<8x256xi1>, vector<8x256xf32>
    %c8_179 = arith.constant 8 : index
    %c256_180 = arith.constant 256 : index
    %353 = vector.load %arg11[%c8_179, %c256_180] : memref<72x512xf32, #tpu.memory_space<vmem>>, vector<8x256xf32>
    tpu.vector_store %arg11[%c8_179, %c256_180], %352 {strides = array<i32>} : memref<72x512xf32, #tpu.memory_space<vmem>>, vector<8x256xf32>,
    %c15_i32_181 = arith.constant 15 : i32
    %354 = tpu.dynamic_rotate %338 by %c15_i32_181 dim 1 : vector<8x256xf32>, i32 -> vector<8x256xf32>
    %c15_i32_182 = arith.constant 15 : i32
    %355 = vector.broadcast %c15_i32_182 : i32 to vector<1x256xi32>
    %356 = arith.cmpi slt, %6, %355 : vector<1x256xi32>
    %357 = arith.andi %2, %356 : vector<1x256xi1>
    %cst_183 = arith.constant 0.000000e+00 : f32
    %358 = vector.broadcast %cst_183 : f32 to vector<8x256xf32>
    %359 = vector.shape_cast %357 : vector<1x256xi1> to vector<1x256xi1>
    %360 = vector.broadcast %359 : vector<1x256xi1> to vector<8x256xi1>
    %361 = arith.select %360, %354, %358 : vector<8x256xi1>, vector<8x256xf32>
    %c16_184 = arith.constant 16 : index
    %c256_185 = arith.constant 256 : index
    %362 = vector.load %arg11[%c16_184, %c256_185] : memref<72x512xf32, #tpu.memory_space<vmem>>, vector<8x256xf32>
    tpu.vector_store %arg11[%c16_184, %c256_185], %361 {strides = array<i32>} : memref<72x512xf32, #tpu.memory_space<vmem>>, vector<8x256xf32>,
    %c1_i32_186 = arith.constant 1 : i32
    %363 = tpu.dynamic_rotate %338 by %c1_i32_186 dim 1 : vector<8x256xf32>, i32 -> vector<8x256xf32>
    %c1_i32_187 = arith.constant 1 : i32
    %364 = vector.broadcast %c1_i32_187 : i32 to vector<1x256xi32>
    %365 = arith.cmpi sge, %6, %364 : vector<1x256xi32>
    %cst_188 = arith.constant 0.000000e+00 : f32
    %366 = vector.broadcast %cst_188 : f32 to vector<8x256xf32>
    %367 = vector.shape_cast %365 : vector<1x256xi1> to vector<1x256xi1>
    %368 = vector.broadcast %367 : vector<1x256xi1> to vector<8x256xi1>
    %369 = arith.select %368, %363, %366 : vector<8x256xi1>, vector<8x256xf32>
    %c24_189 = arith.constant 24 : index
    %c256_190 = arith.constant 256 : index
    %370 = vector.load %arg11[%c24_189, %c256_190] : memref<72x512xf32, #tpu.memory_space<vmem>>, vector<8x256xf32>
    tpu.vector_store %arg11[%c24_189, %c256_190], %369 {strides = array<i32>} : memref<72x512xf32, #tpu.memory_space<vmem>>, vector<8x256xf32>,
    %c32_191 = arith.constant 32 : index
    %c256_192 = arith.constant 256 : index
    %371 = vector.load %arg11[%c32_191, %c256_192] : memref<72x512xf32, #tpu.memory_space<vmem>>, vector<8x256xf32>
    tpu.vector_store %arg11[%c32_191, %c256_192], %338 {strides = array<i32>} : memref<72x512xf32, #tpu.memory_space<vmem>>, vector<8x256xf32>,
    %c255_i32_193 = arith.constant 255 : i32
    %372 = tpu.dynamic_rotate %338 by %c255_i32_193 dim 1 : vector<8x256xf32>, i32 -> vector<8x256xf32>
    %c15_i32_194 = arith.constant 15 : i32
    %373 = vector.broadcast %c15_i32_194 : i32 to vector<1x256xi32>
    %374 = arith.cmpi slt, %6, %373 : vector<1x256xi32>
    %cst_195 = arith.constant 0.000000e+00 : f32
    %375 = vector.broadcast %cst_195 : f32 to vector<8x256xf32>
    %376 = vector.shape_cast %374 : vector<1x256xi1> to vector<1x256xi1>
    %377 = vector.broadcast %376 : vector<1x256xi1> to vector<8x256xi1>
    %378 = arith.select %377, %372, %375 : vector<8x256xi1>, vector<8x256xf32>
    %c40_196 = arith.constant 40 : index
    %c256_197 = arith.constant 256 : index
    %379 = vector.load %arg11[%c40_196, %c256_197] : memref<72x512xf32, #tpu.memory_space<vmem>>, vector<8x256xf32>
    tpu.vector_store %arg11[%c40_196, %c256_197], %378 {strides = array<i32>} : memref<72x512xf32, #tpu.memory_space<vmem>>, vector<8x256xf32>,
    %c241_i32_198 = arith.constant 241 : i32
    %380 = tpu.dynamic_rotate %338 by %c241_i32_198 dim 1 : vector<8x256xf32>, i32 -> vector<8x256xf32>
    %c1_i32_199 = arith.constant 1 : i32
    %381 = vector.broadcast %c1_i32_199 : i32 to vector<1x256xi32>
    %382 = arith.cmpi sge, %6, %381 : vector<1x256xi32>
    %383 = arith.andi %4, %382 : vector<1x256xi1>
    %cst_200 = arith.constant 0.000000e+00 : f32
    %384 = vector.broadcast %cst_200 : f32 to vector<8x256xf32>
    %385 = vector.shape_cast %383 : vector<1x256xi1> to vector<1x256xi1>
    %386 = vector.broadcast %385 : vector<1x256xi1> to vector<8x256xi1>
    %387 = arith.select %386, %380, %384 : vector<8x256xi1>, vector<8x256xf32>
    %c48_201 = arith.constant 48 : index
    %c256_202 = arith.constant 256 : index
    %388 = vector.load %arg11[%c48_201, %c256_202] : memref<72x512xf32, #tpu.memory_space<vmem>>, vector<8x256xf32>
    tpu.vector_store %arg11[%c48_201, %c256_202], %387 {strides = array<i32>} : memref<72x512xf32, #tpu.memory_space<vmem>>, vector<8x256xf32>,
    %c240_i32_203 = arith.constant 240 : i32
    %389 = tpu.dynamic_rotate %338 by %c240_i32_203 dim 1 : vector<8x256xf32>, i32 -> vector<8x256xf32>
    %cst_204 = arith.constant 0.000000e+00 : f32
    %390 = vector.broadcast %cst_204 : f32 to vector<8x256xf32>
    %391 = vector.shape_cast %4 : vector<1x256xi1> to vector<1x256xi1>
    %392 = vector.broadcast %391 : vector<1x256xi1> to vector<8x256xi1>
    %393 = arith.select %392, %389, %390 : vector<8x256xi1>, vector<8x256xf32>
    %c56_205 = arith.constant 56 : index
    %c256_206 = arith.constant 256 : index
    %394 = vector.load %arg11[%c56_205, %c256_206] : memref<72x512xf32, #tpu.memory_space<vmem>>, vector<8x256xf32>
    tpu.vector_store %arg11[%c56_205, %c256_206], %393 {strides = array<i32>} : memref<72x512xf32, #tpu.memory_space<vmem>>, vector<8x256xf32>,
    %c239_i32_207 = arith.constant 239 : i32
    %395 = tpu.dynamic_rotate %338 by %c239_i32_207 dim 1 : vector<8x256xf32>, i32 -> vector<8x256xf32>
    %c15_i32_208 = arith.constant 15 : i32
    %396 = vector.broadcast %c15_i32_208 : i32 to vector<1x256xi32>
    %397 = arith.cmpi slt, %6, %396 : vector<1x256xi32>
    %398 = arith.andi %4, %397 : vector<1x256xi1>
    %cst_209 = arith.constant 0.000000e+00 : f32
    %399 = vector.broadcast %cst_209 : f32 to vector<8x256xf32>
    %400 = vector.shape_cast %398 : vector<1x256xi1> to vector<1x256xi1>
    %401 = vector.broadcast %400 : vector<1x256xi1> to vector<8x256xi1>
    %402 = arith.select %401, %395, %399 : vector<8x256xi1>, vector<8x256xf32>
    %c64_210 = arith.constant 64 : index
    %c256_211 = arith.constant 256 : index
    %403 = vector.load %arg11[%c64_210, %c256_211] : memref<72x512xf32, #tpu.memory_space<vmem>>, vector<8x256xf32>
    tpu.vector_store %arg11[%c64_210, %c256_211], %402 {strides = array<i32>} : memref<72x512xf32, #tpu.memory_space<vmem>>, vector<8x256xf32>,
    %c0_212 = arith.constant 0 : index
    %c0_213 = arith.constant 0 : index
    %404 = vector.load %arg8[%c0_212, %c0_213] : memref<8x72xbf16, #tpu.memory_space<vmem>>, vector<8x72xbf16>
    %c0_214 = arith.constant 0 : index
    %c0_215 = arith.constant 0 : index
    %405 = vector.load %arg11[%c0_214, %c0_215] : memref<72x512xf32, #tpu.memory_space<vmem>>, vector<72x512xf32>
    %406 = arith.truncf %405 : vector<72x512xf32> to vector<72x512xbf16>
    %cst_216 = arith.constant dense<0.000000e+00> : vector<8x512xf32>
    %407 = tpu.matmul %404, %406, %cst_216 {dimension_numbers = #tpu.dot_dimension_numbers<[1], [0], [0], [1], [0, 0, 1, 1], [], []>} : vector<8x72xbf16>, vector<72x512xbf16>, vector<8x512xf32> -> vector<8x512xf32>
    %c0_217 = arith.constant 0 : index
    %c0_218 = arith.constant 0 : index
    %408 = vector.load %arg9[%c0_217, %c0_218] : memref<8x1xf32, #tpu.memory_space<vmem>>, vector<8x1xf32>
    %409 = vector.broadcast %408 : vector<8x1xf32> to vector<8x512xf32>
    %410 = arith.addf %407, %409 : vector<8x512xf32>
    %c0_219 = arith.constant 0 : index
    %c0_220 = arith.constant 0 : index
    %c0_221 = arith.constant 0 : index
    %411 = vector.load %arg1[%c0_219, %c0_220, %c0_221] : memref<2x8x256xf32, #tpu.memory_space<vmem>>, vector<1x8x256xf32>
    %412 = vector.shape_cast %411 : vector<1x8x256xf32> to vector<8x256xf32>
    %413 = vector.extract_strided_slice %410 {offsets = [0, 0], sizes = [8, 256], strides = [1, 1]} : vector<8x512xf32> to vector<8x256xf32>
    %414 = arith.addf %412, %413 : vector<8x256xf32>
    %c0_222 = arith.constant 0 : index
    %c0_223 = arith.constant 0 : index
    %c0_224 = arith.constant 0 : index
    %415 = vector.load %arg10[%c0_222, %c0_223, %c0_224] : memref<2x8x256xf32, #tpu.memory_space<vmem>>, vector<1x8x256xf32>
    %416 = vector.shape_cast %415 : vector<1x8x256xf32> to vector<8x256xf32>
    %417 = vector.shape_cast %414 : vector<8x256xf32> to vector<1x8x256xf32>
    tpu.vector_store %arg10[%c0_222, %c0_223, %c0_224], %417 {strides = array<i32>} : memref<2x8x256xf32, #tpu.memory_space<vmem>>, vector<1x8x256xf32>,
    %c1_225 = arith.constant 1 : index
    %c0_226 = arith.constant 0 : index
    %c0_227 = arith.constant 0 : index
    %418 = vector.load %arg1[%c1_225, %c0_226, %c0_227] : memref<2x8x256xf32, #tpu.memory_space<vmem>>, vector<1x8x256xf32>
    %419 = vector.shape_cast %418 : vector<1x8x256xf32> to vector<8x256xf32>
    %420 = vector.extract_strided_slice %410 {offsets = [0, 256], sizes = [8, 256], strides = [1, 1]} : vector<8x512xf32> to vector<8x256xf32>
    %421 = arith.addf %419, %420 : vector<8x256xf32>
    %c1_228 = arith.constant 1 : index
    %c0_229 = arith.constant 0 : index
    %c0_230 = arith.constant 0 : index
    %422 = vector.load %arg10[%c1_228, %c0_229, %c0_230] : memref<2x8x256xf32, #tpu.memory_space<vmem>>, vector<1x8x256xf32>
    %423 = vector.shape_cast %422 : vector<1x8x256xf32> to vector<8x256xf32>
    %424 = vector.shape_cast %421 : vector<8x256xf32> to vector<1x8x256xf32>
    tpu.vector_store %arg10[%c1_228, %c0_229, %c0_230], %424 {strides = array<i32>} : memref<2x8x256xf32, #tpu.memory_space<vmem>>, vector<1x8x256xf32>,
    return
  }
  func.func @transform_0(%arg0: i32) -> (i32, i32, i32) {
    %c0_i32 = arith.constant 0 : i32
    %c0_i32_0 = arith.constant 0 : i32
    %c0_i32_1 = arith.constant 0 : i32
    return %arg0, %c0_i32, %c0_i32_0 : i32, i32, i32
  }
  func.func @transform_1(%arg0: i32) -> (i32, i32, i32) {
    %c0_i32 = arith.constant 0 : i32
    %c0_i32_0 = arith.constant 0 : i32
    %c0_i32_1 = arith.constant 0 : i32
    return %arg0, %c0_i32, %c0_i32_0 : i32, i32, i32
  }
  func.func @transform_2(%arg0: i32) -> (i32, i32, i32) {
    %c0_i32 = arith.constant 0 : i32
    %c0_i32_0 = arith.constant 0 : i32
    %c0_i32_1 = arith.constant 0 : i32
    return %arg0, %c0_i32, %c0_i32_0 : i32, i32, i32
  }
  func.func @transform_3(%arg0: i32) -> (i32, i32, i32) {
    %c0_i32 = arith.constant 0 : i32
    %c0_i32_0 = arith.constant 0 : i32
    %c0_i32_1 = arith.constant 0 : i32
    return %arg0, %c0_i32, %c0_i32_0 : i32, i32, i32
  }
  func.func @transform_4(%arg0: i32) -> (i32, i32, i32) {
    %c0_i32 = arith.constant 0 : i32
    %c0_i32_0 = arith.constant 0 : i32
    %c0_i32_1 = arith.constant 0 : i32
    return %arg0, %c0_i32, %c0_i32_0 : i32, i32, i32
  }
  func.func @transform_5(%arg0: i32) -> (i32, i32) {
    %c0_i32 = arith.constant 0 : i32
    %c0_i32_0 = arith.constant 0 : i32
    %c0_i32_1 = arith.constant 0 : i32
    return %c0_i32, %c0_i32_0 : i32, i32
  }
  func.func @transform_6(%arg0: i32) -> (i32, i32) {
    %c0_i32 = arith.constant 0 : i32
    %c0_i32_0 = arith.constant 0 : i32
    %c0_i32_1 = arith.constant 0 : i32
    return %c0_i32, %c0_i32_0 : i32, i32
  }
  func.func @transform_7(%arg0: i32) -> (i32, i32) {
    %c0_i32 = arith.constant 0 : i32
    %c0_i32_0 = arith.constant 0 : i32
    %c0_i32_1 = arith.constant 0 : i32
    return %c0_i32, %c0_i32_0 : i32, i32
  }
  func.func @transform_8(%arg0: i32) -> (i32, i32) {
    %c0_i32 = arith.constant 0 : i32
    %c0_i32_0 = arith.constant 0 : i32
    %c0_i32_1 = arith.constant 0 : i32
    return %c0_i32, %c0_i32_0 : i32, i32
  }
  func.func @transform_9(%arg0: i32) -> (i32, i32, i32) {
    %c0_i32 = arith.constant 0 : i32
    %c0_i32_0 = arith.constant 0 : i32
    %c0_i32_1 = arith.constant 0 : i32
    return %arg0, %c0_i32, %c0_i32_0 : i32, i32, i32
  }
}

</mosaic_0001>

<bundles_post_ra>
// kernel: residual_block_forward.1
= control target key start
LH: loop header
LB: loop body
LE: loop exit
PB: predicated region body
PF: predicated region fallthrough
CT: control target
= control target key end

     0   :  { %v1212_v12 = vmov 0   ;;  %s1215_s25 = smov 127   ;;  %s1216_s26 = smov 113   ;;  %v33_v62 = vlaneseq  ;;  %vm1783_vm5 = vcmask 1043456   ;;  %vm1221_vm13 = vmmov 1   ;;  %s1770_s0 = inlined_call_operand.vmem [shape: f32[2,8,256], index: 0, kind: input, shape index: {}]   ;;  %s1771_s1 = inlined_call_operand.vmem [shape: f32[2,8,1], index: 1, kind: input, shape index: {}]   ;;  %s1772_s2 = inlined_call_operand.vmem [shape: f32[2,8,1], index: 2, kind: input, shape index: {}]   ;;  %s1773_s6 = inlined_call_operand.vmem [shape: f32[8,1], index: 6, kind: input, shape index: {}]   ;;  %s1774_s5 = inlined_call_operand.vmem [shape: bf16[8,72], index: 5, kind: input, shape index: {}]   ;;  %s1775_s3 = inlined_call_operand.vmem [shape: f32[2,8,1], index: 3, kind: input, shape index: {}]   ;;  %s1776_s4 = inlined_call_operand.vmem [shape: f32[2,8,1], index: 4, kind: input, shape index: {}]   ;;  %s1777_s8 = inlined_call_operand.vmem [shape: f32[8,1], index: 8, kind: input, shape index: {}]   ;;  %s1778_s7 = inlined_call_operand.vmem [shape: bf16[8,72], index: 7, kind: input, shape index: {}]   ;;  %s1779_s9 = inlined_call_operand.vmem [shape: f32[2,8,256], index: 9, kind: output, shape index: {}]  }
   0x1   :  { %v42_v0 = vld [vmem:[%s1770_s0] sm:$0xff]  ;;  %v43_v1 = vld [vmem:[%s1770_s0 + $0x8] sm:$0xff]  ;;  %v1281_v2 = vld [vmem:[%s1770_s0 + $0x10] sm:$0xff]  ;;  %1042 = vset.pattern.permute.xlu0 %v1212_v12  ;;  %1043 = vset.pattern.permute.xlu1 %v1212_v12  ;;  %s1217_s27 = smov 1   ;;  %s1218_s28 = smov 16  }
   0x2   :  { %v46_v3 = vadd.f32 %v43_v1, %v42_v0  ;;  %v49_v4 = vmul.f32 %v42_v0, %v42_v0  ;;  %v50_v5 = vmul.f32 %v43_v1, %v43_v1  ;;  %v919_v6 = vld [vmem:[%s1770_s0 + $0x18] sm:$0xff]  ;;  %v225_v7 = vmul.f32 %v1281_v2, %v1281_v2  ;;  %451 = vmatprep.mubr.bf16.mxu0 %v1212_v12  ;;  %v44_v29 = vld [vmem:[%s1771_s1] sm:$0xff]  ;;  %v920_v31 = vld [vmem:[%s1771_s1 + $0x8] sm:$0xff]  ;;  %s1213_s1 = smov 111   ;;  %s1219_s29 = smov 15  }
   0x3   :  { %v226_v8 = vmul.f32 %v919_v6, %v919_v6  ;;  %v222_v10 = vadd.f32 %v919_v6, %v1281_v2  ;;  %492 = vmatprep.mubr.bf16.mxu1 %v1212_v12  ;;  %v59_v30 = vadd.f32 1.0, %v44_v29  ;;  %v235_v34 = vadd.f32 1.0, %v920_v31  ;;  %v45_v38 = vld [vmem:[%s1772_s2] sm:$0xff]  ;;  %v921_v41 = vld [vmem:[%s1772_s2 + $0x8] sm:$0xff]  ;;  %s1214_s2 = smov 112   ;;  %s1220_s30 = smov 17  }
   0x4   :  { %47 = vadd.xlane.f32.xlu0 %v46_v3  ;;  %v51_v9 = vadd.f32 %v50_v5, %v49_v4  ;;  %v396_v61 = vld [vmem:[%s1773_s6] sm:$0xff]  ;;  %v1345_v63 = vand.u32 127, %v33_v62 }
   0x5   :  { %v227_v11 = vadd.f32 %v226_v8, %v225_v7 }
   0x6   :  { %52 = vadd.xlane.f32.xlu1 %v51_v9  ;;  %vm1784_vm2 = vcmp.lt.s32.totalorder %v1345_v63, 111  ;;  %vm1780_vm7 = vcmp.lt.s32.totalorder %v1345_v63, 112  ;;  %vm1781_vm8 = vcmp.lt.s32.totalorder %v1345_v63, 113  ;;  %vm1782_vm12 = vcmp.lt.s32.totalorder %v1345_v63, 127 }
   0x8   :  { %223 = vadd.xlane.f32.xlu0 %v222_v10 }
   0xa   :  { %228 = vadd.xlane.f32.xlu1 %v227_v11 }
  0x8d   :  { %v48_v13 = vpop.xlane.xlu0 %47 }
  0x8e   :  { %v54_v14 = vmul.f32 0.00390625, %v48_v13 }
  0x8f   :  { %v53_v15 = vpop.xlane.xlu1 %52 }
  0x90   :  { %v56_v16 = vmul.f32 %v54_v14, %v54_v14  ;;  %v55_v17 = vmul.f32 0.00390625, %v53_v15 }
  0x91   :  { %v224_v18 = vpop.xlane.xlu0 %223 }
  0x92   :  { %v57_v19 = vsub.f32 %v55_v17, %v56_v16  ;;  %v230_v20 = vmul.f32 0.00390625, %v224_v18 }
  0x93   :  { %v229_v21 = vpop.xlane.xlu1 %228 }
  0x94   :  { %v58_v22 = vmax.f32 %v57_v19, 0.0  ;;  %v232_v23 = vmul.f32 %v230_v20, %v230_v20  ;;  %v231_v24 = vmul.f32 0.00390625, %v229_v21 }
  0x96   :  { %v60_v25 = vadd.f32 1e-05, %v58_v22  ;;  %v233_v26 = vsub.f32 %v231_v24, %v232_v23 }
  0x98   :  { %1204 = vrsqrt.f32 %v60_v25  ;;  %v234_v27 = vmax.f32 %v233_v26, 0.0 }
  0x9a   :  { %v236_v28 = vadd.f32 1e-05, %v234_v27 }
  0x9c   :  { %1206 = vrsqrt.f32 %v236_v28 }
  0xa5   :  { %v1205_v32 = vpop.eup %1204 }
  0xa6   :  { %v62_v33 = vmul.f32 %v1205_v32, %v59_v30 }
  0xa8   :  { %67 = vperm.xlu0 %1042, %v62_v33   ;;  %v63_v37 = vmul.f32 %v62_v33, %v54_v14 }
  0xa9   :  { %v1207_v35 = vpop.eup %1206 }
  0xaa   :  { %v238_v36 = vmul.f32 %v1207_v35, %v235_v34  ;;  %v64_v39 = vsub.f32 %v45_v38, %v63_v37 }
  0xac   :  { %243 = vperm.xlu1 %1043, %v238_v36   ;;  %v239_v40 = vmul.f32 %v238_v36, %v230_v20 }
  0xae   :  { %v240_v42 = vsub.f32 %v921_v41, %v239_v40 }
  0xb0   :  { %74 = vperm.xlu1 %1043, %v64_v39  }
  0xb4   :  { %250 = vperm.xlu1 %1043, %v240_v42  }
 0x123   :  { %v68_v43 = vpop.permute.xlu0 %67 }
 0x124   :  { %v70_v45 = vmul.f32 %v68_v43, %v42_v0  ;;  %v71_v46 = vmul.f32 %v68_v43, %v43_v1  ;;  %v35_v0 = vadd.s32 128, %v1345_v63 }
 0x126   :  { %v41_v1 = vand.u32 15, %v35_v0  ;;  %vm39_vm0 = vcmp.lt.s32.totalorder %v35_v0, 240 }
 0x127   :  { %v244_v44 = vpop.permute.xlu1 %243 }
 0x128   :  { %v246_v50 = vmul.f32 %v1281_v2, %v244_v44  ;;  %v247_v51 = vmul.f32 %v919_v6, %v244_v44  ;;  %v40_v2 = vand.u32 15, %v1345_v63  ;;  %vm1349_vm1 = vcmp.lt.s32.totalorder %v41_v1, 15 }
 0x129   :  { %vm1357_vm3 = vmand %vm39_vm0, %vm1349_vm1  ;;  %vm1383_vm6 = vcmp.ge.s32.totalorder %v41_v1, 1 }
 0x12a   :  { %vm1361_vm4 = vcmp.lt.s32.totalorder %v40_v2, 15  ;;  %vm174_vm9 = vmand %vm39_vm0, %vm1383_vm6  ;;  %vm1394_vm10 = vcmp.ge.s32.totalorder %v40_v2, 1 }
 0x12b   :  { %v75_v47 = vpop.permute.xlu1 %74  ;;  %vm1407_vm11 = vmpackc.low %vm39_vm0, %vm174_vm9  ;;  %vm36_vm0 = vcmp.ge.s32.totalorder %v1345_v63, 16  ;;  %vm1785_vm9 = vcmp.lt.s32.totalorder %v1345_v63, 1 }
 0x12c   :  { %v1305_v48 = vadd.f32 %v75_v47, %v70_v45  ;;  %v1307_v49 = vadd.f32 %v75_v47, %v71_v46  ;;  %vm1415_vm14 = vmpackc.low %vm1221_vm13, %vm1394_vm10 }
 0x12d   :  { %vm1436_vm15 = vmpackc.low %vm1349_vm1, %vm1221_vm13 }
 0x12e   :  { %v79_v52 = vmax.f32 %v1305_v48, 0.0  ;;  %v80_v53 = vmax.f32 %v1307_v49, 0.0 }
 0x12f   :  { %v251_v54 = vpop.permute.xlu1 %250 }
 0x130   :  { %v1312_v55 = vadd.f32 %v251_v54, %v246_v50  ;;  %v1314_v56 = vadd.f32 %v251_v54, %v247_v51  ;;  %v1044_v57 = vpack.i.bf16 %v80_v53, %v79_v52 }
 0x132   :  { %v255_v58 = vmax.f32 %v1312_v55, 0.0  ;;  %v256_v59 = vmax.f32 %v1314_v56, 0.0  ;;  %1045 = vrot.lane.b32.xlu1 %v1044_v57, %s1213_s1 }
 0x134   :  { %v1069_v60 = vpack.i.bf16 %v256_v59, %v255_v58 }
 0x136   :  { %1070 = vrot.lane.b32.xlu0 %v1069_v60, %s1214_s2  ;;  %1050 = vrot.lane.b32.xlu1 %v1069_v60, %s1213_s1 }
 0x13a   :  { %1080 = vrot.lane.b32.xlu0 %v1069_v60, %s1215_s25  ;;  %1055 = vrot.lane.b32.xlu1 %v1044_v57, %s1216_s26 }
 0x13e   :  { %1090 = vrot.lane.b32.xlu0 %v1044_v57, %s1217_s27  ;;  %1060 = vrot.lane.b32.xlu1 %v1044_v57, %s1214_s2 }
 0x142   :  { %1100 = vrot.lane.b32.xlu0 %v1069_v60, %s1217_s27  ;;  %1065 = vrot.lane.b32.xlu1 %v1069_v60, %s1216_s26 }
 0x146   :  { %1110 = vrot.lane.b32.xlu0 %v1044_v57, %s1218_s28  ;;  %1075 = vrot.lane.b32.xlu1 %v1044_v57, %s1215_s25 }
 0x14a   :  { %1120 = vrot.lane.b32.xlu0 %v1069_v60, %s1218_s28  ;;  %1085 = vrot.lane.b32.xlu1 %v1044_v57, %s1219_s29 }
 0x14e   :  { %1095 = vrot.lane.b32.xlu1 %v1069_v60, %s1219_s29 }
 0x152   :  { %1105 = vrot.lane.b32.xlu1 %v1044_v57, %s1220_s30 }
 0x156   :  { %1115 = vrot.lane.b32.xlu1 %v1069_v60, %s1220_s30 }
 0x15a   :  { %399 = vperm.xlu1 %1043, %v396_v61  }
 0x1a4   :  { %v1046_v4 = vpop.permute.xlu1 %1045 }
 0x1a5   :  { %v1048_v5 = vunpack.i.h.bf16 %v1046_v4  ;;  %v1047_v6 = vunpack.i.l.bf16 %v1046_v4 }
 0x1a7   :  { %v204_v9 = vsel %vm1784_vm2, %v1048_v5, %v1047_v6  ;;  %v203_v10 = vsel %vm1784_vm2, %v1047_v6, %v1048_v5 }
 0x1a8   :  { %v1051_v11 = vpop.permute.xlu1 %1050  ;;  %v1071_v13 = vpop.permute.xlu0 %1070  ;;  %v212_v14 = vsel %vm1357_vm3, %v204_v9, 0.0  ;;  %v211_v15 = vsel %vm1361_vm4, %v203_v10, 0.0 }
 0x1a9   :  { %v1053_v16 = vunpack.i.h.bf16 %v1051_v11  ;;  %v1052_v17 = vunpack.i.l.bf16 %v1051_v11  ;;  %v393_v18 = vpack.c.bf16 %v212_v14, %v212_v14  ;;  %v392_v19 = vpack.c.bf16 %v211_v15, %v211_v15 }
 0x1aa   :  { %v1073_v37 = vunpack.i.h.bf16 %v1071_v13  ;;  %v1072_v38 = vunpack.i.l.bf16 %v1071_v13 }
 0x1ab   :  { %v334_v20 = vsel %vm1784_vm2, %v1053_v16, %v1052_v17  ;;  %v333_v21 = vsel %vm1784_vm2, %v1052_v17, %v1053_v16  ;;  %922 = vmatprep.subr.msk.bf16.mxu0 %vm1783_vm5, %v393_v18  ;;  %v408_v23 = vsel %vm1783_vm5, %v392_v19, 0 }
 0x1ac   :  { %v1056_v22 = vpop.permute.xlu1 %1055  ;;  %v1081_v24 = vpop.permute.xlu0 %1080  ;;  %v336_v25 = vsel %vm1357_vm3, %v334_v20, 0.0  ;;  %v335_v26 = vsel %vm1361_vm4, %v333_v21, 0.0  ;;  %426 = vmatpush1.bf16.msra.mxu0 %v408_v23  ;;  %v323_v61 = vsel %vm1780_vm7, %v1072_v38, %v1073_v37  ;;  %v324_v62 = vsel %vm1780_vm7, %v1073_v37, %v1072_v38 }
 0x1ad   :  { %v395_v28 = vpack.c.bf16 %v336_v25, %v336_v25  ;;  %v394_v29 = vpack.c.bf16 %v335_v26, %v335_v26  ;;  %v1058_v30 = vunpack.i.h.bf16 %v1056_v22  ;;  %v1057_v31 = vunpack.i.l.bf16 %v1056_v22 }
 0x1ae   :  { %v1083_v39 = vunpack.i.h.bf16 %v1081_v24  ;;  %v1082_v40 = vunpack.i.l.bf16 %v1081_v24 }
 0x1af   :  { %924 = vmatprep.subr.msk.bf16.mxu1 %vm1783_vm5, %v395_v28  ;;  %v414_v33 = vsel %vm1783_vm5, %v394_v29, 0  ;;  %v171_v42 = vsel %vm1781_vm8, %v1057_v31, %v1058_v30  ;;  %v172_v43 = vsel %vm1781_vm8, %v1058_v30, %v1057_v31  ;;  %vm1494_vm5 = vmpackc.low %vm1383_vm6, %vm1349_vm1  ;;  %vm104_vm1 = vcmp.lt.s32.totalorder %v1345_v63, 16 }
 0x1b0   :  { %v1061_v32 = vpop.permute.xlu1 %1060  ;;  %467 = vmatpush1.bf16.msra.mxu1 %v414_v33  ;;  %v1091_v41 = vpop.permute.xlu0 %1090  ;;  %v304_v0 = vsel %vm1782_vm12, %v1083_v39, %v1082_v40  ;;  %v303_v17 = vsel %vm1782_vm12, %v1082_v40, %v1083_v39 }
 0x1b1   :  { %v1063_v34 = vunpack.i.h.bf16 %v1061_v32  ;;  %v1062_v35 = vunpack.i.l.bf16 %v1061_v32  ;;  %v967_v14 = vpack.c.bf16 %v304_v0, %v256_v59  ;;  %v1093_v15 = vunpack.i.h.bf16 %v1091_v41 }
 0x1b2   :  { %v1092_v16 = vunpack.i.l.bf16 %v1091_v41  ;;  %v970_v49 = vpack.c.bf16 %v303_v17, %v255_v58 }
 0x1b3   :  { %v188_v44 = vsel %vm1780_vm7, %v1062_v35, %v1063_v34  ;;  %v189_v45 = vsel %vm1780_vm7, %v1063_v34, %v1062_v35  ;;  %vm1786_vm7 = vcmp.lt.s32.totalorder %v1345_v63, 15 }
 0x1b4   :  { %v937_v47 = vpack.c.bf16 %v189_v45, %v172_v43  ;;  %v940_v50 = vpack.c.bf16 %v188_v44, %v171_v42  ;;  %v1066_v51 = vpop.permute.xlu1 %1065  ;;  %v1101_v6 = vpop.permute.xlu0 %1100 }
 0x1b5   :  { %v1068_v57 = vunpack.i.h.bf16 %v1066_v51  ;;  %v1067_v60 = vunpack.i.l.bf16 %v1066_v51  ;;  %v1103_v25 = vunpack.i.h.bf16 %v1101_v6  ;;  %v1102_v26 = vunpack.i.l.bf16 %v1101_v6 }
 0x1b6   :  { %938 = vmatprep.subr.msk.bf16.mxu0 %vm1407_vm11, %v937_v47 }
 0x1b7   :  { %v313_v1 = vsel %vm1781_vm8, %v1067_v60, %v1068_v57  ;;  %v314_v2 = vsel %vm1781_vm8, %v1068_v57, %v1067_v60  ;;  %941 = vmatpush1.bf16.msk.msra.mxu0 %vm1415_vm14, %v940_v50  ;;  %vm1464_vm8 = vmpackc.low %vm1361_vm4, %vm1221_vm13  ;;  %v291_v37 = vsel %vm1785_vm9, %v1102_v26, %v1103_v25  ;;  %v292_v38 = vsel %vm1785_vm9, %v1103_v25, %v1102_v26 }
 0x1b8   :  { %v961_v4 = vpack.c.bf16 %v324_v62, %v314_v2  ;;  %v964_v5 = vpack.c.bf16 %v323_v61, %v313_v1  ;;  %v1076_v9 = vpop.permute.xlu1 %1075  ;;  %v1111_v24 = vpop.permute.xlu0 %1110 }
 0x1b9   :  { %v1078_v10 = vunpack.i.h.bf16 %v1076_v9  ;;  %v1077_v11 = vunpack.i.l.bf16 %v1076_v9  ;;  %v1113_v34 = vunpack.i.h.bf16 %v1111_v24  ;;  %v1112_v35 = vunpack.i.l.bf16 %v1111_v24 }
 0x1ba   :  { %962 = vmatprep.subr.msk.bf16.mxu1 %vm1407_vm11, %v961_v4  ;;  %v932_v4 = vld [vmem:[%s1770_s0 + $0x10] sm:$0xff] }
 0x1bb   :  { %v156_v18 = vsel %vm1782_vm12, %v1077_v11, %v1078_v10  ;;  %v157_v19 = vsel %vm1782_vm12, %v1078_v10, %v1077_v11  ;;  %965 = vmatpush1.bf16.msk.msra.mxu1 %vm1415_vm14, %v964_v5  ;;  %vm1472_vm12 = vmand %vm36_vm0, %vm1361_vm4  ;;  %v105_v50 = vsel %vm104_vm1, %v1112_v35, %v1113_v34  ;;  %v106_v51 = vsel %vm104_vm1, %v1113_v34, %v1112_v35 }
 0x1bc   :  { %v943_v56 = vpack.c.bf16 %v157_v19, %v80_v53  ;;  %v946_v59 = vpack.c.bf16 %v156_v18, %v79_v52  ;;  %v1086_v20 = vpop.permute.xlu1 %1085  ;;  %968 = vmatprep.subr.msk.bf16.mxu1 %vm1436_vm15, %v967_v14  ;;  %v139_v52 = vsel %vm1785_vm9, %v1092_v16, %v1093_v15  ;;  %v140_v53 = vsel %vm1785_vm9, %v1093_v15, %v1092_v16  ;;  %vm1504_vm2 = vmpackc.low %vm1394_vm10, %vm1472_vm12  ;;  %v1121_v41 = vpop.permute.xlu0 %1120  ;;  %v339_v14 = vld [vmem:[%s1774_s5] sm:$0xf] }
 0x1bd   :  { %v1088_v22 = vunpack.i.h.bf16 %v1086_v20  ;;  %v1087_v23 = vunpack.i.l.bf16 %v1086_v20  ;;  %vm1787_vm12 = vcmp.lt.s32.totalorder %v1345_v63, 17  ;;  %vm90_vm9 = vmand %vm36_vm0, %vm1394_vm10  ;;  %v1123_v57 = vunpack.i.h.bf16 %v1121_v41 }
 0x1be   :  { %944 = vmatprep.subr.msk.bf16.mxu0 %vm1436_vm15, %v943_v56  ;;  %v1122_v60 = vunpack.i.l.bf16 %v1121_v41  ;;  %vm1541_vm10 = vmpackc.low %vm1221_vm13, %vm1383_vm6  ;;  %vm1816_vm6 = vcmp.lt.s32.totalorder %v1345_v63, 17 }
 0x1bf   :  { %v120_v28 = vsel %vm1786_vm7, %v1087_v23, %v1088_v22  ;;  %v121_v29 = vsel %vm1786_vm7, %v1088_v22, %v1087_v23  ;;  %947 = vmatpush1.bf16.msk.msra.mxu0 %vm1464_vm8, %v946_v59  ;;  %971 = vmatpush1.bf16.msk.msra.mxu1 %vm1464_vm8, %v970_v49  ;;  %vm1817_vm13 = vmmov %vm1816_vm6 }
 0x1c0   :  { %v949_v58 = vpack.c.bf16 %v139_v52, %v120_v28  ;;  %v952_v30 = vpack.c.bf16 %v140_v53, %v121_v29  ;;  %v1096_v31 = vpop.permute.xlu1 %1095  ;;  %v271_v27 = vsel %vm104_vm1, %v1122_v60, %v1123_v57  ;;  %v272_v9 = vsel %vm104_vm1, %v1123_v57, %v1122_v60  ;;  %v501_v57 = vld [vmem:[%s1775_s3] sm:$0xff] }
 0x1c1   :  { %v1098_v3 = vunpack.i.h.bf16 %v1096_v31  ;;  %v1097_v33 = vunpack.i.l.bf16 %v1096_v31  ;;  %v516_v60 = vadd.f32 1.0, %v501_v57 }
 0x1c2   :  { %950 = vmatprep.subr.msk.bf16.mxu0 %vm1494_vm5, %v949_v58 }
 0x1c3   :  { %v281_v39 = vsel %vm1786_vm7, %v1097_v33, %v1098_v3  ;;  %v282_v40 = vsel %vm1786_vm7, %v1098_v3, %v1097_v33  ;;  %953 = vmatpush1.bf16.msk.msra.mxu0 %vm1504_vm2, %v952_v30  ;;  %vm1547_vm7 = vmpackc.low %vm36_vm0, %vm90_vm9  ;;  %vm1818_vm0 = vcmp.lt.s32.totalorder %v1345_v63, 111 }
 0x1c4   :  { %v973_v42 = vpack.c.bf16 %v291_v37, %v281_v39  ;;  %v976_v43 = vpack.c.bf16 %v292_v38, %v282_v40  ;;  %v1106_v44 = vpop.permute.xlu1 %1105  ;;  %vm1819_vm9 = vmmov %vm1818_vm0 }
 0x1c5   :  { %v1108_v45 = vunpack.i.h.bf16 %v1106_v44  ;;  %v1107_v47 = vunpack.i.l.bf16 %v1106_v44 }
 0x1c6   :  { %974 = vmatprep.subr.msk.bf16.mxu1 %vm1494_vm5, %v973_v42 }
 0x1c7   :  { %v86_v61 = vsel %vm1787_vm12, %v1107_v47, %v1108_v45  ;;  %v87_v36 = vsel %vm1787_vm12, %v1108_v45, %v1107_v47  ;;  %977 = vmatpush1.bf16.msk.msra.mxu1 %vm1504_vm2, %v976_v43  ;;  %vm402_vm12 = vcmask 588800  }
 0x1c8   :  { %v955_v0 = vpack.c.bf16 %v105_v50, %v86_v61  ;;  %v958_v1 = vpack.c.bf16 %v106_v51, %v87_v36  ;;  %v1116_v2 = vpop.permute.xlu1 %1115  ;;  %v926_v61 = vld [vmem:[%s1775_s3 + $0x8] sm:$0xff] }
 0x1c9   :  { %v1118_v5 = vunpack.i.h.bf16 %v1116_v2  ;;  %v1117_v6 = vunpack.i.l.bf16 %v1116_v2  ;;  %v502_v2 = vld [vmem:[%s1776_s4] sm:$0xff] }
 0x1ca   :  { %956 = vmatprep.subr.msk.bf16.mxu0 %vm1541_vm10, %v955_v0 }
 0x1cb   :  { %v261_v10 = vsel %vm1816_vm6, %v1117_v6, %v1118_v5  ;;  %v262_v11 = vsel %vm1817_vm13, %v1118_v5, %v1117_v6  ;;  %959 = vmatpush1.bf16.msk.msra.mxu0 %vm1547_vm7, %v958_v1  ;;  %v637_v1 = vadd.f32 1.0, %v926_v61  ;;  %vm1820_vm6 = vmmov %vm1818_vm0 }
 0x1cc   :  { %v979_v15 = vpack.c.bf16 %v271_v27, %v261_v10  ;;  %v982_v16 = vpack.c.bf16 %v272_v9, %v262_v11  ;;  %v927_v10 = vld [vmem:[%s1776_s4 + $0x8] sm:$0xff]  ;;  %vm1821_vm13 = vmmov %vm1818_vm0 }
 0x1ce   :  { %923 = vmatmul.mubr.msk.bf16.vlgmr.msra.gmra.mxu0 %vm402_vm12, %v339_v14  ;;  %980 = vmatprep.subr.msk.bf16.mxu1 %vm1541_vm10, %v979_v15 }
 0x1cf   :  { %983 = vmatpush1.bf16.msk.msra.mxu1 %vm1547_vm7, %v982_v16  ;;  %851 = vmatprep.mubr.bf16.mxu0 %v1212_v12 }
 0x1d2   :  { %925 = vmatmul.mubr.msk.bf16.vlgmr.msra.gmra.mxu1 %vm402_vm12, %v339_v14 }
 0x1d3   :  { %892 = vmatprep.mubr.bf16.mxu1 %v1212_v12 }
 0x1d5   :  { %v400_v18 = vpop.permute.xlu1 %399 }
 0x28e   :  { %v453_v17 = vpop.f32.mrf.mxu0 }
 0x28f   :  { %v454_v56 = vadd.f32 %v453_v17, %v400_v18 }
 0x290   :  { %v455_v19 = vpop.f32.mrf.mxu0 }
 0x291   :  { %v456_v59 = vadd.f32 %v455_v19, %v400_v18  ;;  %v506_v25 = vmul.f32 %v454_v56, %v454_v56 }
 0x292   :  { %v457_v20 = vpop.f32.mrf.mxu0  ;;  %v494_v22 = vpop.f32.mrf.mxu1 }
 0x293   :  { %v503_v23 = vadd.f32 %v456_v59, %v454_v56  ;;  %v507_v48 = vmul.f32 %v456_v59, %v456_v59  ;;  %v495_v53 = vadd.f32 %v494_v22, %v400_v18 }
 0x294   :  { %v458_v49 = vpop.f32.mrf.mxu0  ;;  %v496_v52 = vpop.f32.mrf.mxu1 }
 0x295   :  { %v497_v24 = vadd.f32 %v496_v52, %v400_v18  ;;  %504 = vadd.xlane.f32.xlu0 %v503_v23  ;;  %v508_v28 = vadd.f32 %v507_v48, %v506_v25  ;;  %v627_v30 = vmul.f32 %v495_v53, %v495_v53 }
 0x296   :  { %v498_v26 = vpop.f32.mrf.mxu1 }
 0x297   :  { %v624_v29 = vadd.f32 %v497_v24, %v495_v53  ;;  %v628_v58 = vmul.f32 %v497_v24, %v497_v24 }
 0x298   :  { %v499_v12 = vpop.f32.mrf.mxu1 }
 0x299   :  { %509 = vadd.xlane.f32.xlu0 %v508_v28  ;;  %625 = vadd.xlane.f32.xlu1 %v624_v29  ;;  %v629_v31 = vadd.f32 %v628_v58, %v627_v30 }
 0x29d   :  { %630 = vadd.xlane.f32.xlu0 %v629_v31 }
 0x31e   :  { %v505_v3 = vpop.xlane.xlu0 %504 }
 0x31f   :  { %v511_v33 = vmul.f32 0.00390625, %v505_v3 }
 0x321   :  { %v513_v37 = vmul.f32 %v511_v33, %v511_v33 }
 0x322   :  { %v510_v34 = vpop.xlane.xlu0 %509  ;;  %v626_v35 = vpop.xlane.xlu1 %625 }
 0x323   :  { %v512_v38 = vmul.f32 0.00390625, %v510_v34  ;;  %v632_v39 = vmul.f32 0.00390625, %v626_v35 }
 0x325   :  { %v514_v40 = vsub.f32 %v512_v38, %v513_v37  ;;  %v634_v43 = vmul.f32 %v632_v39, %v632_v39 }
 0x326   :  { %v631_v41 = vpop.xlane.xlu0 %630 }
 0x327   :  { %v515_v42 = vmax.f32 %v514_v40, 0.0  ;;  %v633_v44 = vmul.f32 0.00390625, %v631_v41 }
 0x329   :  { %v517_v45 = vadd.f32 1e-05, %v515_v42  ;;  %v635_v47 = vsub.f32 %v633_v44, %v634_v43 }
 0x32b   :  { %1208 = vrsqrt.f32 %v517_v45  ;;  %v636_v50 = vmax.f32 %v635_v47, 0.0 }
 0x32d   :  { %v638_v51 = vadd.f32 1e-05, %v636_v50 }
 0x32f   :  { %1210 = vrsqrt.f32 %v638_v51 }
 0x338   :  { %v1209_v36 = vpop.eup %1208 }
 0x339   :  { %v519_v0 = vmul.f32 %v1209_v36, %v516_v60 }
 0x33b   :  { %524 = vperm.xlu1 %1043, %v519_v0   ;;  %v520_v5 = vmul.f32 %v519_v0, %v511_v33 }
 0x33c   :  { %v1211_v6 = vpop.eup %1210 }
 0x33d   :  { %v521_v27 = vsub.f32 %v502_v2, %v520_v5  ;;  %v640_v9 = vmul.f32 %v1211_v6, %v637_v1 }
 0x33f   :  { %531 = vperm.xlu1 %1043, %v521_v27   ;;  %645 = vperm.xlu0 %1042, %v640_v9   ;;  %v641_v11 = vmul.f32 %v640_v9, %v632_v39 }
 0x341   :  { %v642_v14 = vsub.f32 %v927_v10, %v641_v11 }
 0x343   :  { %652 = vperm.xlu1 %1043, %v642_v14  }
 0x3b6   :  { %v525_v15 = vpop.permute.xlu1 %524 }
 0x3b7   :  { %v527_v16 = vmul.f32 %v525_v15, %v454_v56  ;;  %v528_v17 = vmul.f32 %v525_v15, %v456_v59 }
 0x3ba   :  { %v646_v18 = vpop.permute.xlu0 %645  ;;  %v532_v19 = vpop.permute.xlu1 %531 }
 0x3bb   :  { %v1586_v20 = vadd.f32 %v532_v19, %v527_v16  ;;  %v1588_v22 = vadd.f32 %v532_v19, %v528_v17  ;;  %v648_v23 = vmul.f32 %v646_v18, %v495_v53  ;;  %v649_v48 = vmul.f32 %v646_v18, %v497_v24  ;;  %v798_v24 = vld [vmem:[%s1777_s8] sm:$0xff] }
 0x3bd   :  { %v536_v49 = vmax.f32 %v1586_v20, 0.0  ;;  %v537_v52 = vmax.f32 %v1588_v22, 0.0 }
 0x3be   :  { %v653_v25 = vpop.permute.xlu1 %652 }
 0x3bf   :  { %v1592_v26 = vadd.f32 %v653_v25, %v648_v23  ;;  %v1594_v28 = vadd.f32 %v653_v25, %v649_v48  ;;  %v1124_v56 = vpack.i.bf16 %v537_v52, %v536_v49 }
 0x3c1   :  { %v657_v59 = vmax.f32 %v1592_v26, 0.0  ;;  %v658_v29 = vmax.f32 %v1594_v28, 0.0  ;;  %1125 = vrot.lane.b32.xlu0 %v1124_v56, %s1213_s1 }
 0x3c3   :  { %v1129_v53 = vpack.i.bf16 %v658_v29, %v657_v59 }
 0x3c5   :  { %1135 = vrot.lane.b32.xlu0 %v1124_v56, %s1216_s26  ;;  %1130 = vrot.lane.b32.xlu1 %v1129_v53, %s1213_s1 }
 0x3c9   :  { %1145 = vrot.lane.b32.xlu0 %v1129_v53, %s1216_s26  ;;  %1140 = vrot.lane.b32.xlu1 %v1124_v56, %s1214_s2 }
 0x3cd   :  { %1155 = vrot.lane.b32.xlu0 %v1124_v56, %s1215_s25  ;;  %1150 = vrot.lane.b32.xlu1 %v1129_v53, %s1214_s2 }
 0x3d1   :  { %1165 = vrot.lane.b32.xlu0 %v1124_v56, %s1219_s29  ;;  %1160 = vrot.lane.b32.xlu1 %v1129_v53, %s1215_s25 }
 0x3d5   :  { %1175 = vrot.lane.b32.xlu0 %v1129_v53, %s1219_s29  ;;  %1170 = vrot.lane.b32.xlu1 %v1124_v56, %s1217_s27 }
 0x3d9   :  { %1185 = vrot.lane.b32.xlu0 %v1124_v56, %s1220_s30  ;;  %1180 = vrot.lane.b32.xlu1 %v1129_v53, %s1217_s27 }
 0x3dd   :  { %1195 = vrot.lane.b32.xlu0 %v1129_v53, %s1220_s30  ;;  %1190 = vrot.lane.b32.xlu1 %v1124_v56, %s1218_s28 }
 0x3e1   :  { %801 = vperm.xlu0 %1042, %v798_v24   ;;  %1200 = vrot.lane.b32.xlu1 %v1129_v53, %s1218_s28 }
 0x433   :  { %v1126_v58 = vpop.permute.xlu0 %1125 }
 0x434   :  { %v1128_v12 = vunpack.i.h.bf16 %v1126_v58  ;;  %v1127_v30 = vunpack.i.l.bf16 %v1126_v58 }
 0x436   :  { %v614_v31 = vsel %vm1818_vm0, %v1127_v30, %v1128_v12  ;;  %v615_v3 = vsel %vm1819_vm9, %v1128_v12, %v1127_v30  ;;  %vm1822_vm0 = vcmask 1043456  }
 0x437   :  { %v617_v33 = vsel %vm1357_vm3, %v615_v3, 0.0  ;;  %v1136_v34 = vpop.permute.xlu0 %1135  ;;  %v1131_v35 = vpop.permute.xlu1 %1130  ;;  %v616_v37 = vsel %vm1361_vm4, %v614_v31, 0.0  ;;  %vm1823_vm9 = vmmov %vm1822_vm0 }
 0x438   :  { %v1133_v38 = vunpack.i.h.bf16 %v1131_v35  ;;  %v1132_v39 = vunpack.i.l.bf16 %v1131_v35  ;;  %v795_v40 = vpack.c.bf16 %v617_v33, %v617_v33  ;;  %v794_v41 = vpack.c.bf16 %v616_v37, %v616_v37 }
 0x439   :  { %v1138_v42 = vunpack.i.h.bf16 %v1136_v34  ;;  %v1137_v43 = vunpack.i.l.bf16 %v1136_v34 }
 0x43a   :  { %v735_v44 = vsel %vm1820_vm6, %v1132_v39, %v1133_v38  ;;  %v736_v45 = vsel %vm1821_vm13, %v1133_v38, %v1132_v39  ;;  %928 = vmatprep.subr.msk.bf16.mxu0 %vm1822_vm0, %v795_v40  ;;  %v808_v50 = vsel %vm1823_vm9, %v794_v41, 0  ;;  %vm1824_vm6 = vcmp.lt.s32.totalorder %v1345_v63, 113 }
 0x43b   :  { %v738_v47 = vsel %vm1357_vm3, %v736_v45, 0.0  ;;  %v1146_v51 = vpop.permute.xlu0 %1145  ;;  %v1141_v57 = vpop.permute.xlu1 %1140  ;;  %v737_v60 = vsel %vm1361_vm4, %v735_v44, 0.0  ;;  %826 = vmatpush1.bf16.msra.mxu0 %v808_v50  ;;  %v594_v7 = vsel %vm1824_vm6, %v1137_v43, %v1138_v42  ;;  %vm1825_vm3 = vmmov %vm1824_vm6  ;;  %vm1826_vm13 = vcmp.lt.s32.totalorder %v1345_v63, 112 }
 0x43c   :  { %v1143_v61 = vunpack.i.h.bf16 %v1141_v57  ;;  %v1142_v36 = vunpack.i.l.bf16 %v1141_v57  ;;  %v1148_v0 = vunpack.i.h.bf16 %v1146_v51  ;;  %v1147_v1 = vunpack.i.l.bf16 %v1146_v51  ;;  %vm1827_vm0 = vmmov %vm1826_vm13 }
 0x43d   :  { %v797_v2 = vpack.c.bf16 %v738_v47, %v738_v47  ;;  %v796_v5 = vpack.c.bf16 %v737_v60, %v737_v60  ;;  %v595_v6 = vsel %vm1825_vm3, %v1138_v42, %v1137_v43  ;;  %vm1828_vm4 = vmmov %vm1823_vm9 }
 0x43e   :  { %v604_v27 = vsel %vm1826_vm13, %v1142_v36, %v1143_v61  ;;  %v605_v8 = vsel %vm1827_vm0, %v1143_v61, %v1142_v36  ;;  %vm1829_vm9 = vmmov %vm1828_vm4  ;;  %v716_v48 = vsel %vm1825_vm3, %v1148_v0, %v1147_v1  ;;  %vm1831_vm13 = vcmp.lt.s32.totalorder %v1345_v63, 127 }
 0x43f   :  { %v985_v9 = vpack.c.bf16 %v605_v8, %v595_v6  ;;  %v988_v10 = vpack.c.bf16 %v604_v27, %v594_v7  ;;  %930 = vmatprep.subr.msk.bf16.mxu1 %vm1828_vm4, %v797_v2  ;;  %v1156_v11 = vpop.permute.xlu0 %1155  ;;  %v1151_v14 = vpop.permute.xlu1 %1150  ;;  %v814_v15 = vsel %vm1829_vm9, %v796_v5, 0  ;;  %vm1830_vm6 = vmmov %vm1825_vm3  ;;  %vm1833_vm4 = vcmp.lt.s32.totalorder %v1345_v63, 112 }
 0x440   :  { %v1158_v16 = vunpack.i.h.bf16 %v1156_v11  ;;  %v1157_v17 = vunpack.i.l.bf16 %v1156_v11  ;;  %v1153_v18 = vunpack.i.h.bf16 %v1151_v14  ;;  %v1152_v19 = vunpack.i.l.bf16 %v1151_v14  ;;  %867 = vmatpush1.bf16.msra.mxu1 %v814_v15  ;;  %vm1832_vm0 = vmmov %vm1831_vm13 }
 0x441   :  { %v715_v23 = vsel %vm1830_vm6, %v1147_v1, %v1148_v0  ;;  %986 = vmatprep.subr.msk.bf16.mxu0 %vm1407_vm11, %v985_v9  ;;  %vm1834_vm9 = vmmov %vm1833_vm4 }
 0x442   :  { %v584_v25 = vsel %vm1831_vm13, %v1157_v17, %v1158_v16  ;;  %v585_v56 = vsel %vm1832_vm0, %v1158_v16, %v1157_v17  ;;  %v725_v53 = vsel %vm1833_vm4, %v1152_v19, %v1153_v18  ;;  %v726_v24 = vsel %vm1834_vm9, %v1153_v18, %v1152_v19  ;;  %989 = vmatpush1.bf16.msk.msra.mxu0 %vm1415_vm14, %v988_v10  ;;  %vm1835_vm6 = vmmov %vm1832_vm0 }
 0x443   :  { %v991_v58 = vpack.c.bf16 %v585_v56, %v537_v52  ;;  %v994_v12 = vpack.c.bf16 %v584_v25, %v536_v49  ;;  %v1009_v30 = vpack.c.bf16 %v726_v24, %v716_v48  ;;  %v1012_v31 = vpack.c.bf16 %v725_v53, %v715_v23  ;;  %v1166_v3 = vpop.permute.xlu0 %1165  ;;  %v1161_v33 = vpop.permute.xlu1 %1160  ;;  %vm1836_vm3 = vmmov %vm1832_vm0  ;;  %v741_v25 = vld [vmem:[%s1778_s7] sm:$0xf] }
 0x444   :  { %v1163_v34 = vunpack.i.h.bf16 %v1161_v33  ;;  %v1162_v35 = vunpack.i.l.bf16 %v1161_v33  ;;  %v1168_v37 = vunpack.i.h.bf16 %v1166_v3  ;;  %v1167_v38 = vunpack.i.l.bf16 %v1166_v3 }
 0x445   :  { %992 = vmatprep.subr.msk.bf16.mxu0 %vm1436_vm15, %v991_v58  ;;  %1010 = vmatprep.subr.msk.bf16.mxu1 %vm1407_vm11, %v1009_v30  ;;  %vm1837_vm11 = vcmp.lt.s32.totalorder %v1345_v63, 15  ;;  %vm1839_vm0 = vcmp.lt.s32.totalorder %v1345_v63, 1  ;;  %v901_v58 = vld [vmem:[%s1770_s0] sm:$0xff] }
 0x446   :  { %v705_v22 = vsel %vm1835_vm6, %v1162_v35, %v1163_v34  ;;  %v706_v20 = vsel %vm1836_vm3, %v1163_v34, %v1162_v35  ;;  %995 = vmatpush1.bf16.msk.msra.mxu0 %vm1464_vm8, %v994_v12  ;;  %1013 = vmatpush1.bf16.msk.msra.mxu1 %vm1415_vm14, %v1012_v31  ;;  %v562_v42 = vsel %vm1837_vm11, %v1167_v38, %v1168_v37  ;;  %vm1838_vm13 = vmmov %vm1837_vm11  ;;  %vm1845_vm6 = vcmp.lt.s32.totalorder %v1345_v63, 17  ;;  %v902_v31 = vld [vmem:[%s1770_s0 + $0x8] sm:$0xff] }
 0x447   :  { %v1015_v49 = vpack.c.bf16 %v706_v20, %v658_v29  ;;  %v1018_v52 = vpack.c.bf16 %v705_v22, %v657_v59  ;;  %v1176_v46 = vpop.permute.xlu0 %1175  ;;  %v1171_v39 = vpop.permute.xlu1 %1170  ;;  %v563_v43 = vsel %vm1838_vm13, %v1168_v37, %v1167_v38  ;;  %vm1840_vm14 = vmmov %vm1839_vm0  ;;  %v933_v20 = vld [vmem:[%s1770_s0 + $0x18] sm:$0xff] }
 0x448   :  { %v1173_v40 = vunpack.i.h.bf16 %v1171_v39  ;;  %v1172_v41 = vunpack.i.l.bf16 %v1171_v39  ;;  %v1178_v28 = vunpack.i.h.bf16 %v1176_v46  ;;  %v1177_v29 = vunpack.i.l.bf16 %v1176_v46  ;;  %vm1842_vm4 = vmmov %vm1837_vm11 }
 0x449   :  { %1016 = vmatprep.subr.msk.bf16.mxu1 %vm1436_vm15, %v1015_v49  ;;  %vm1841_vm15 = vmmov %vm1837_vm11 }
 0x44a   :  { %v572_v26 = vsel %vm1839_vm0, %v1172_v41, %v1173_v40  ;;  %v573_v54 = vsel %vm1840_vm14, %v1173_v40, %v1172_v41  ;;  %1019 = vmatpush1.bf16.msk.msra.mxu1 %vm1464_vm8, %v1018_v52  ;;  %v683_v60 = vsel %vm1841_vm15, %v1177_v29, %v1178_v28  ;;  %v684_v61 = vsel %vm1842_vm4, %v1178_v28, %v1177_v29  ;;  %vm1843_vm9 = vmmov %vm1839_vm0 }
 0x44b   :  { %v997_v59 = vpack.c.bf16 %v572_v26, %v562_v42  ;;  %v1000_v44 = vpack.c.bf16 %v573_v54, %v563_v43  ;;  %v1186_v45 = vpop.permute.xlu0 %1185  ;;  %v1181_v47 = vpop.permute.xlu1 %1180  ;;  %vm1844_vm8 = vmmov %vm1839_vm0 }
 0x44c   :  { %v1183_v50 = vunpack.i.h.bf16 %v1181_v47  ;;  %v1182_v51 = vunpack.i.l.bf16 %v1181_v47  ;;  %v1188_v57 = vunpack.i.h.bf16 %v1186_v45  ;;  %v1187_v13 = vunpack.i.l.bf16 %v1186_v45  ;;  %vm1846_vm3 = vmmov %vm1845_vm6 }
 0x44d   :  { %998 = vmatprep.subr.msk.bf16.mxu0 %vm1494_vm5, %v997_v59  ;;  %vm1848_vm11 = vmmov %vm1846_vm3 }
 0x44e   :  { %v693_v36 = vsel %vm1843_vm9, %v1182_v51, %v1183_v50  ;;  %v694_v21 = vsel %vm1844_vm8, %v1183_v50, %v1182_v51  ;;  %1001 = vmatpush1.bf16.msk.msra.mxu0 %vm1504_vm2, %v1000_v44  ;;  %v542_v27 = vsel %vm1845_vm6, %v1187_v13, %v1188_v57  ;;  %v543_v8 = vsel %vm1846_vm3, %v1188_v57, %v1187_v13 }
 0x44f   :  { %v1021_v0 = vpack.c.bf16 %v693_v36, %v683_v60  ;;  %v1024_v1 = vpack.c.bf16 %v694_v21, %v684_v61  ;;  %v1196_v2 = vpop.permute.xlu0 %1195  ;;  %v1191_v5 = vpop.permute.xlu1 %1190 }
 0x450   :  { %v1193_v7 = vunpack.i.h.bf16 %v1191_v5  ;;  %v1192_v6 = vunpack.i.l.bf16 %v1191_v5  ;;  %v1198_v9 = vunpack.i.h.bf16 %v1196_v2  ;;  %v1197_v10 = vunpack.i.l.bf16 %v1196_v2 }
 0x451   :  { %1022 = vmatprep.subr.msk.bf16.mxu1 %vm1494_vm5, %v1021_v0  ;;  %vm1847_vm5 = vmmov %vm1846_vm3 }
 0x452   :  { %v552_v11 = vsel %vm104_vm1, %v1192_v6, %v1193_v7  ;;  %v553_v14 = vsel %vm104_vm1, %v1193_v7, %v1192_v6  ;;  %1025 = vmatpush1.bf16.msk.msra.mxu1 %vm1504_vm2, %v1024_v1  ;;  %v663_v55 = vsel %vm1847_vm5, %v1197_v10, %v1198_v9  ;;  %v664_v23 = vsel %vm1848_vm11, %v1198_v9, %v1197_v10 }
 0x453   :  { %v1003_v15 = vpack.c.bf16 %v552_v11, %v542_v27  ;;  %v1006_v16 = vpack.c.bf16 %v553_v14, %v543_v8  ;;  %v1201_v17 = vpop.permute.xlu1 %1200 }
 0x454   :  { %v1203_v18 = vunpack.i.h.bf16 %v1201_v17  ;;  %v1202_v19 = vunpack.i.l.bf16 %v1201_v17 }
 0x455   :  { %1004 = vmatprep.subr.msk.bf16.mxu0 %vm1541_vm10, %v1003_v15 }
 0x456   :  { %v673_v48 = vsel %vm104_vm1, %v1202_v19, %v1203_v18  ;;  %v674_v32 = vsel %vm104_vm1, %v1203_v18, %v1202_v19  ;;  %1007 = vmatpush1.bf16.msk.msra.mxu0 %vm1547_vm7, %v1006_v16 }
 0x457   :  { %v1027_v56 = vpack.c.bf16 %v673_v48, %v663_v55  ;;  %v1030_v53 = vpack.c.bf16 %v674_v32, %v664_v23 }
 0x459   :  { %929 = vmatmul.mubr.msk.bf16.vlgmr.msra.gmra.mxu0 %vm402_vm12, %v741_v25  ;;  %1028 = vmatprep.subr.msk.bf16.mxu1 %vm1541_vm10, %v1027_v56 }
 0x45a   :  { %1031 = vmatpush1.bf16.msk.msra.mxu1 %vm1547_vm7, %v1030_v53 }
 0x45c   :  { %v802_v63 = vpop.permute.xlu0 %801 }
 0x45d   :  { %931 = vmatmul.mubr.msk.bf16.vlgmr.msra.gmra.mxu1 %vm402_vm12, %v741_v25 }
 0x519   :  { %v853_v24 = vpop.f32.mrf.mxu0 }
 0x51a   :  { %v854_v12 = vadd.f32 %v853_v24, %v802_v63 }
 0x51b   :  { %v855_v30 = vpop.f32.mrf.mxu0 }
 0x51c   :  { %v903_v3 = vadd.f32 %v901_v58, %v854_v12  ;;  %v856_v62 = vadd.f32 %v855_v30, %v802_v63 }
 0x51d   :  { %v857_v33 = vpop.f32.mrf.mxu0  ;;  %v894_v34 = vpop.f32.mrf.mxu1 }
 0x51e   :  { %905 = vst [vmem:[%s1779_s9] sm:$0xff] %v903_v3  ;;  %v904_v35 = vadd.f32 %v902_v31, %v856_v62  ;;  %v895_v37 = vadd.f32 %v894_v34, %v802_v63 }
 0x51f   :  { %v858_v38 = vpop.f32.mrf.mxu0  ;;  %v896_v22 = vpop.f32.mrf.mxu1 }
 0x520   :  { %906 = vst [vmem:[%s1779_s9 + $0x8] sm:$0xff] %v904_v35  ;;  %v909_v49 = vadd.f32 %v932_v4, %v895_v37  ;;  %v897_v52 = vadd.f32 %v896_v22, %v802_v63 }
 0x521   :  { %v898_v46 = vpop.f32.mrf.mxu1 }
 0x522   :  { %934 = vst [vmem:[%s1779_s9 + $0x10] sm:$0xff] %v909_v49  ;;  %v910_v39 = vadd.f32 %v933_v20, %v897_v52 }
 0x523   :  { %v899_v40 = vpop.f32.mrf.mxu1 }
 0x524   :  { %935 = vst [vmem:[%s1779_s9 + $0x18] sm:$0xff] %v910_v39 }

</bundles_post_ra>
